<compile_context>
chip_gen: v7x
topology: tpu7x:2x2x1
jax: 0.10.0
libtpu: 0.0.40
codegen_flags: <defaults>
</compile_context>

<pallas_src>
import math

import jax
import jax.numpy as jnp
from jax.experimental import pallas as pl
from jax.experimental.pallas import tpu as pltpu

# ------------------------- model hyper-parameters ---------------------------
N_HEADS = 4                  # n_heads
EMBED = 32                   # embedding_dim
HID = EMBED // N_HEADS       # per-head dim
FF_HIDDEN = 64               # feed_forward_hidden
N_BLOCKS = 2                 # n_blocks_graph
BN_EPS = 1e-5
PACK_LANES = 128             # lane width of the packed bias/norm slab


# ------------------------------ helpers -------------------------------------
def _batch_norm(x, gamma, beta):
    """BatchNorm1d over the (B*N) rows, single-pass statistics."""
    n = x.shape[0]
    s1 = jnp.sum(x, axis=0, keepdims=True)
    s2 = jnp.sum(x * x, axis=0, keepdims=True)
    mu = s1 * (1.0 / n)
    var = jnp.maximum(s2 * (1.0 / n) - mu * mu, 0.0)
    inv = jax.lax.rsqrt(var + BN_EPS)
    return (x - mu) * inv * gamma + beta


# ------------------------------ Pallas kernel -------------------------------
def _encoder_kernel(prob_ref, init_ref, bias_ref, wqkv_ref, wo_ref,
                    ff1w_ref, ff2w_ref, ge_ref, avg_ref):
    """Full GraphEncoder_CVRP + mean pooling, fused in one kernel."""
    B, N, _ = prob_ref.shape
    E, H, Dh, F = EMBED, N_HEADS, HID, FF_HIDDEN
    L = wqkv_ref.shape[0]
    inv_sqrt_dh = 1.0 / math.sqrt(Dh)
    bf16, f32 = jnp.bfloat16, jnp.float32

    prob = prob_ref[...]                                    # [B, N, 3]
    iw = init_ref[...]                                      # [8, E] packed
    dep_w, node_w = iw[0:2, :], iw[2:5, :]
    dep_b, node_b = iw[5:6, :], iw[6:7, :]

    # ---- initial node embeddings: depot rows only use (x, y) ----------------
    xy0 = prob[:, 0, :2]                                    # [B, 2]
    h_dep = jnp.dot(xy0, dep_w, preferred_element_type=f32) + dep_b     # [B, E]
    h_cust = (jnp.dot(prob.reshape(B * N, 3), node_w,
                      preferred_element_type=f32) + node_b).reshape(B, N, E)
    node_idx = jax.lax.broadcasted_iota(jnp.int32, (B, N, 1), 1)
    h = jnp.where(node_idx == 0, h_dep[:, None, :], h_cust).reshape(B * N, E)

    # ---- encoder blocks (small, static unroll) ------------------------------
    for l in range(L):
        bp = bias_ref[l]                                    # [6, PACK_LANES]
        g1, b1 = bp[0:1, :E], bp[1:2, :E]
        g2, b2 = bp[2:3, :E], bp[3:4, :E]
        ff2_b, ff1_b = bp[4:5, :E], bp[5:6, :F]
        wqkv = wqkv_ref[l].astype(bf16)                     # [E, 3E]
        wo = wo_ref[l]                                      # [E, E]
        ff1w = ff1w_ref[l].astype(bf16)                     # [E, F]
        ff2w = ff2w_ref[l].astype(bf16)                     # [F, E]

        # fused QKV projection: one [B*N, E] x [E, 3E] MXU pass (bf16 in, f32 acc)
        qkv = jnp.dot(h.astype(bf16), wqkv, preferred_element_type=f32)   # [BN, 3E]

        # Stack per-head q/k/v head-major along the LEADING axis so all heads go
        # through a single batched einsum + one softmax chain (leading-axis
        # concat/slices only; no lane-dim relayouts, no multi-batch dot_general).
        def head_major(base):
            parts = [qkv[:, base + hh * Dh: base + (hh + 1) * Dh].reshape(B, N, Dh)
                     for hh in range(H)]
            return jnp.concatenate(parts, axis=0)           # [H*B, N, Dh]

        q_all = head_major(0).astype(bf16)
        k_all = head_major(E).astype(bf16)
        v_all = head_major(2 * E).astype(bf16)

        sc = jnp.einsum('bqd,bkd->bqk', q_all, k_all,
                        preferred_element_type=f32) * inv_sqrt_dh         # [H*B, N, N]
        sc = sc - jnp.max(sc, axis=-1, keepdims=True)
        e = jnp.exp(sc)
        attn = e * pl.reciprocal(jnp.sum(e, axis=-1, keepdims=True), approx=True)
        o_all = jnp.einsum('bqk,bkd->bqd', attn.astype(bf16), v_all,
                           preferred_element_type=f32)                    # [H*B, N, Dh]

        # output projection: accumulate each head through its W_out row block
        # (avoids a lane-direction head-merge concat)
        mha = jnp.zeros((B * N, E), f32)
        for hh in range(H):
            o_h = o_all[hh * B:(hh + 1) * B].reshape(B * N, Dh).astype(bf16)
            mha = mha + jnp.dot(o_h, wo[hh * Dh:(hh + 1) * Dh, :].astype(bf16),
                                preferred_element_type=f32)

        # residual + norm
        h = _batch_norm(h + mha, g1, b1)

        # feed-forward + residual + norm
        f = jnp.dot(h.astype(bf16), ff1w, preferred_element_type=f32) + ff1_b
        f = jnp.maximum(f, 0.0)
        f = jnp.dot(f.astype(bf16), ff2w, preferred_element_type=f32) + ff2_b
        h = _batch_norm(h + f, g2, b2)

    ge_ref[...] = h                                          # 2-D [B*N, E] slab
    avg_ref[...] = jnp.mean(h.reshape(B, N, E), axis=1)      # [B, E]


# ------------------------------ wrapper -------------------------------------
def am_pre_actor_forward(params, problems):
    """AM_preActor.forward: problems [B, N, 3] -> (graph_embed, avg_graph_embed)."""
    B, N, _ = problems.shape
    inputs = (problems, params["init_pack"], params["bias_pack"],
              params["wqkv"], params["wo"], params["ff1_w"], params["ff2_w"])
    vmem = pl.BlockSpec(memory_space=pltpu.MemorySpace.VMEM)
    ge2d, avg = pl.pallas_call(
        _encoder_kernel,
        out_shape=(jax.ShapeDtypeStruct((B * N, EMBED), jnp.float32),
                   jax.ShapeDtypeStruct((B, EMBED), jnp.float32)),
        in_specs=[vmem] * len(inputs),
        out_specs=(vmem, vmem),
        compiler_params=pltpu.CompilerParams(vmem_limit_bytes=32 * 1024 * 1024),
    )(*inputs)
    return ge2d.reshape(B, N, EMBED), avg


# ------------------------------- init ---------------------------------------
def init_params(key):
    """AM_Actor.init_parameters: uniform(-stdv, stdv), stdv = 1/sqrt(fan)."""
    E, F, L = EMBED, FF_HIDDEN, N_BLOCKS
    keys = iter(jax.random.split(key, 24))

    def u(shape, fan):
        s = 1.0 / math.sqrt(fan)
        return jax.random.uniform(next(keys), shape, jnp.float32, -s, s)

    # init-embedding pack: rows 0-1 dep_w, 2-4 node_w, 5 dep_b, 6 node_b
    init_pack = jnp.zeros((8, E), jnp.float32)
    init_pack = init_pack.at[0:2].set(u((2, E), 2))
    init_pack = init_pack.at[2:5].set(u((3, E), 3))
    init_pack = init_pack.at[5:6].set(u((1, E), E))
    init_pack = init_pack.at[6:7].set(u((1, E), E))

    # per-layer matmul weight stacks (fused W_q|W_k|W_v; heads contiguous)
    wqkv = u((L, E, 3 * E), E)
    wo = u((L, E, E), E)
    ff1_w = u((L, E, F), E)
    ff2_w = u((L, F, E), F)

    # per-layer small-vector pack: g1, b1, g2, b2, ff2_b (width E), ff1_b (width F)
    bias_pack = jnp.zeros((L, 6, PACK_LANES), jnp.float32)
    bias_pack = bias_pack.at[:, 0, :E].set(u((L, E), E))     # gamma after MHA
    bias_pack = bias_pack.at[:, 1, :E].set(u((L, E), E))     # beta  after MHA
    bias_pack = bias_pack.at[:, 2, :E].set(u((L, E), E))     # gamma after FF
    bias_pack = bias_pack.at[:, 3, :E].set(u((L, E), E))     # beta  after FF
    bias_pack = bias_pack.at[:, 4, :E].set(u((L, E), E))     # FF layer-2 bias
    bias_pack = bias_pack.at[:, 5, :F].set(u((L, F), F))     # FF layer-1 bias

    return {"init_pack": init_pack, "bias_pack": bias_pack,
            "wqkv": wqkv, "wo": wo, "ff1_w": ff1_w, "ff2_w": ff2_w}


# ------------------------------- demo ---------------------------------------
if __name__ == "__main__":
    B, N = 2, 8                              # batch_size, problem_size

    key = jax.random.PRNGKey(0)
    k_par, k_coord, k_dem = jax.random.split(key, 3)

    params = init_params(k_par)

    coords = jax.random.uniform(k_coord, (B, N, 2), jnp.float32)
    cust_demand = jax.random.uniform(k_dem, (B, N - 1), jnp.float32, 0.05, 0.30)
    demand = jnp.concatenate([jnp.zeros((B, 1), jnp.float32), cust_demand], axis=1)
    problems = jnp.concatenate([coords, demand[:, :, None]], axis=2)   # [B, N, 3]

    fwd = jax.jit(am_pre_actor_forward)
    graph_embed, avg_graph_embed = fwd(params, problems)
    jax.block_until_ready((graph_embed, avg_graph_embed))

    assert graph_embed.shape == (B, N, EMBED)
    assert avg_graph_embed.shape == (B, EMBED)
    assert bool(jnp.all(jnp.isfinite(graph_embed)))
    assert bool(jnp.allclose(avg_graph_embed, jnp.mean(graph_embed, axis=1),
                             atol=1e-3))
    print("KERNEL_OK")
</pallas_src>

<mosaic_0001>
module attributes {stable_mosaic.version = 11 : i64} {
  func.func @_encoder_kernel(%arg0: memref<2x8x3xf32, #tpu.memory_space<vmem>>, %arg1: memref<8x32xf32, #tpu.memory_space<vmem>>, %arg2: memref<2x6x128xf32, #tpu.memory_space<vmem>>, %arg3: memref<2x32x96xf32, #tpu.memory_space<vmem>>, %arg4: memref<2x32x32xf32, #tpu.memory_space<vmem>>, %arg5: memref<2x32x64xf32, #tpu.memory_space<vmem>>, %arg6: memref<2x64x32xf32, #tpu.memory_space<vmem>>, %arg7: memref<16x32xf32, #tpu.memory_space<vmem>>, %arg8: memref<2x32xf32, #tpu.memory_space<vmem>>) attributes {dimension_semantics = [], scalar_prefetch = 0 : i64, scratch_operands = 0 : i64, tpu.core_type = #tpu.core_type<tc>} {
    %c0 = arith.constant 0 : index
    %c0_0 = arith.constant 0 : index
    %c0_1 = arith.constant 0 : index
    %0 = vector.load %arg0[%c0, %c0_0, %c0_1] : memref<2x8x3xf32, #tpu.memory_space<vmem>>, vector<2x8x3xf32>
    %c0_2 = arith.constant 0 : index
    %c0_3 = arith.constant 0 : index
    %1 = vector.load %arg1[%c0_2, %c0_3] : memref<8x32xf32, #tpu.memory_space<vmem>>, vector<8x32xf32>
    %2 = vector.extract_strided_slice %1 {offsets = [0, 0], sizes = [2, 32], strides = [1, 1]} : vector<8x32xf32> to vector<2x32xf32>
    %3 = vector.extract_strided_slice %1 {offsets = [2, 0], sizes = [3, 32], strides = [1, 1]} : vector<8x32xf32> to vector<3x32xf32>
    %4 = vector.extract_strided_slice %1 {offsets = [5, 0], sizes = [1, 32], strides = [1, 1]} : vector<8x32xf32> to vector<1x32xf32>
    %5 = vector.extract_strided_slice %1 {offsets = [6, 0], sizes = [1, 32], strides = [1, 1]} : vector<8x32xf32> to vector<1x32xf32>
    %6 = vector.extract_strided_slice %0 {offsets = [0, 0, 0], sizes = [2, 1, 2], strides = [1, 1, 1]} : vector<2x8x3xf32> to vector<2x1x2xf32>
    %7 = vector.shape_cast %6 : vector<2x1x2xf32> to vector<2x2xf32>
    %cst = arith.constant dense<0.000000e+00> : vector<2x32xf32>
    %8 = tpu.matmul %7, %2, %cst {dimension_numbers = #tpu.dot_dimension_numbers<[1], [0], [0], [1], [0, 0, 1, 1], [], []>} : vector<2x2xf32>, vector<2x32xf32>, vector<2x32xf32> -> vector<2x32xf32>
    %9 = vector.broadcast %4 : vector<1x32xf32> to vector<2x32xf32>
    %10 = arith.addf %8, %9 : vector<2x32xf32>
    %11 = vector.shape_cast %0 : vector<2x8x3xf32> to vector<16x3xf32>
    %cst_4 = arith.constant dense<0.000000e+00> : vector<16x32xf32>
    %12 = tpu.matmul %11, %3, %cst_4 {dimension_numbers = #tpu.dot_dimension_numbers<[1], [0], [0], [1], [0, 0, 1, 1], [], []>} : vector<16x3xf32>, vector<3x32xf32>, vector<16x32xf32> -> vector<16x32xf32>
    %13 = vector.broadcast %5 : vector<1x32xf32> to vector<16x32xf32>
    %14 = arith.addf %12, %13 : vector<16x32xf32>
    %15 = vector.shape_cast %14 : vector<16x32xf32> to vector<2x8x32xf32>
    %16 = tpu.iota {dimensions = array<i32: 1>} : vector<2x8x1xi32>
    %c0_i32 = arith.constant 0 : i32
    %17 = vector.broadcast %c0_i32 : i32 to vector<2x8x1xi32>
    %18 = arith.cmpi eq, %16, %17 : vector<2x8x1xi32>
    %19 = vector.shape_cast %10 : vector<2x32xf32> to vector<2x1x32xf32>
    %20 = vector.shape_cast %18 : vector<2x8x1xi1> to vector<2x8x1xi1>
    %21 = vector.broadcast %20 : vector<2x8x1xi1> to vector<2x8x32xi1>
    %22 = vector.shape_cast %19 : vector<2x1x32xf32> to vector<2x1x32xf32>
    %23 = vector.broadcast %22 : vector<2x1x32xf32> to vector<2x8x32xf32>
    %24 = arith.select %21, %23, %15 : vector<2x8x32xi1>, vector<2x8x32xf32>
    %25 = vector.shape_cast %24 : vector<2x8x32xf32> to vector<16x32xf32>
    %c0_5 = arith.constant 0 : index
    %c0_6 = arith.constant 0 : index
    %c0_7 = arith.constant 0 : index
    %26 = vector.load %arg2[%c0_5, %c0_6, %c0_7] : memref<2x6x128xf32, #tpu.memory_space<vmem>>, vector<1x6x128xf32>
    %27 = vector.shape_cast %26 : vector<1x6x128xf32> to vector<6x128xf32>
    %28 = vector.extract_strided_slice %27 {offsets = [0, 0], sizes = [1, 32], strides = [1, 1]} : vector<6x128xf32> to vector<1x32xf32>
    %29 = vector.extract_strided_slice %27 {offsets = [1, 0], sizes = [1, 32], strides = [1, 1]} : vector<6x128xf32> to vector<1x32xf32>
    %30 = vector.extract_strided_slice %27 {offsets = [2, 0], sizes = [1, 32], strides = [1, 1]} : vector<6x128xf32> to vector<1x32xf32>
    %31 = vector.extract_strided_slice %27 {offsets = [3, 0], sizes = [1, 32], strides = [1, 1]} : vector<6x128xf32> to vector<1x32xf32>
    %32 = vector.extract_strided_slice %27 {offsets = [4, 0], sizes = [1, 32], strides = [1, 1]} : vector<6x128xf32> to vector<1x32xf32>
    %33 = vector.extract_strided_slice %27 {offsets = [5, 0], sizes = [1, 64], strides = [1, 1]} : vector<6x128xf32> to vector<1x64xf32>
    %c0_8 = arith.constant 0 : index
    %c0_9 = arith.constant 0 : index
    %c0_10 = arith.constant 0 : index
    %34 = vector.load %arg3[%c0_8, %c0_9, %c0_10] : memref<2x32x96xf32, #tpu.memory_space<vmem>>, vector<1x32x96xf32>
    %35 = vector.shape_cast %34 : vector<1x32x96xf32> to vector<32x96xf32>
    %36 = arith.truncf %35 : vector<32x96xf32> to vector<32x96xbf16>
    %c0_11 = arith.constant 0 : index
    %c0_12 = arith.constant 0 : index
    %c0_13 = arith.constant 0 : index
    %37 = vector.load %arg4[%c0_11, %c0_12, %c0_13] : memref<2x32x32xf32, #tpu.memory_space<vmem>>, vector<1x32x32xf32>
    %38 = vector.shape_cast %37 : vector<1x32x32xf32> to vector<32x32xf32>
    %c0_14 = arith.constant 0 : index
    %c0_15 = arith.constant 0 : index
    %c0_16 = arith.constant 0 : index
    %39 = vector.load %arg5[%c0_14, %c0_15, %c0_16] : memref<2x32x64xf32, #tpu.memory_space<vmem>>, vector<1x32x64xf32>
    %40 = vector.shape_cast %39 : vector<1x32x64xf32> to vector<32x64xf32>
    %41 = arith.truncf %40 : vector<32x64xf32> to vector<32x64xbf16>
    %c0_17 = arith.constant 0 : index
    %c0_18 = arith.constant 0 : index
    %c0_19 = arith.constant 0 : index
    %42 = vector.load %arg6[%c0_17, %c0_18, %c0_19] : memref<2x64x32xf32, #tpu.memory_space<vmem>>, vector<1x64x32xf32>
    %43 = vector.shape_cast %42 : vector<1x64x32xf32> to vector<64x32xf32>
    %44 = arith.truncf %43 : vector<64x32xf32> to vector<64x32xbf16>
    %45 = arith.truncf %25 : vector<16x32xf32> to vector<16x32xbf16>
    %cst_20 = arith.constant dense<0.000000e+00> : vector<16x96xf32>
    %46 = tpu.matmul %45, %36, %cst_20 {dimension_numbers = #tpu.dot_dimension_numbers<[1], [0], [0], [1], [0, 0, 1, 1], [], []>} : vector<16x32xbf16>, vector<32x96xbf16>, vector<16x96xf32> -> vector<16x96xf32>
    %47 = vector.extract_strided_slice %46 {offsets = [0, 0], sizes = [16, 8], strides = [1, 1]} : vector<16x96xf32> to vector<16x8xf32>
    %48 = vector.shape_cast %47 : vector<16x8xf32> to vector<2x8x8xf32>
    %49 = vector.extract_strided_slice %46 {offsets = [0, 8], sizes = [16, 8], strides = [1, 1]} : vector<16x96xf32> to vector<16x8xf32>
    %50 = vector.shape_cast %49 : vector<16x8xf32> to vector<2x8x8xf32>
    %51 = vector.extract_strided_slice %46 {offsets = [0, 16], sizes = [16, 8], strides = [1, 1]} : vector<16x96xf32> to vector<16x8xf32>
    %52 = vector.shape_cast %51 : vector<16x8xf32> to vector<2x8x8xf32>
    %53 = vector.extract_strided_slice %46 {offsets = [0, 24], sizes = [16, 8], strides = [1, 1]} : vector<16x96xf32> to vector<16x8xf32>
    %54 = vector.shape_cast %53 : vector<16x8xf32> to vector<2x8x8xf32>
    %55 = tpu.concatenate %48, %50, %52, %54 in 0 : vector<2x8x8xf32>, vector<2x8x8xf32>, vector<2x8x8xf32>, vector<2x8x8xf32> -> vector<8x8x8xf32>
    %56 = arith.truncf %55 : vector<8x8x8xf32> to vector<8x8x8xbf16>
    %57 = vector.extract_strided_slice %46 {offsets = [0, 32], sizes = [16, 8], strides = [1, 1]} : vector<16x96xf32> to vector<16x8xf32>
    %58 = vector.shape_cast %57 : vector<16x8xf32> to vector<2x8x8xf32>
    %59 = vector.extract_strided_slice %46 {offsets = [0, 40], sizes = [16, 8], strides = [1, 1]} : vector<16x96xf32> to vector<16x8xf32>
    %60 = vector.shape_cast %59 : vector<16x8xf32> to vector<2x8x8xf32>
    %61 = vector.extract_strided_slice %46 {offsets = [0, 48], sizes = [16, 8], strides = [1, 1]} : vector<16x96xf32> to vector<16x8xf32>
    %62 = vector.shape_cast %61 : vector<16x8xf32> to vector<2x8x8xf32>
    %63 = vector.extract_strided_slice %46 {offsets = [0, 56], sizes = [16, 8], strides = [1, 1]} : vector<16x96xf32> to vector<16x8xf32>
    %64 = vector.shape_cast %63 : vector<16x8xf32> to vector<2x8x8xf32>
    %65 = tpu.concatenate %58, %60, %62, %64 in 0 : vector<2x8x8xf32>, vector<2x8x8xf32>, vector<2x8x8xf32>, vector<2x8x8xf32> -> vector<8x8x8xf32>
    %66 = arith.truncf %65 : vector<8x8x8xf32> to vector<8x8x8xbf16>
    %67 = vector.extract_strided_slice %46 {offsets = [0, 64], sizes = [16, 8], strides = [1, 1]} : vector<16x96xf32> to vector<16x8xf32>
    %68 = vector.shape_cast %67 : vector<16x8xf32> to vector<2x8x8xf32>
    %69 = vector.extract_strided_slice %46 {offsets = [0, 72], sizes = [16, 8], strides = [1, 1]} : vector<16x96xf32> to vector<16x8xf32>
    %70 = vector.shape_cast %69 : vector<16x8xf32> to vector<2x8x8xf32>
    %71 = vector.extract_strided_slice %46 {offsets = [0, 80], sizes = [16, 8], strides = [1, 1]} : vector<16x96xf32> to vector<16x8xf32>
    %72 = vector.shape_cast %71 : vector<16x8xf32> to vector<2x8x8xf32>
    %73 = vector.extract_strided_slice %46 {offsets = [0, 88], sizes = [16, 8], strides = [1, 1]} : vector<16x96xf32> to vector<16x8xf32>
    %74 = vector.shape_cast %73 : vector<16x8xf32> to vector<2x8x8xf32>
    %75 = tpu.concatenate %68, %70, %72, %74 in 0 : vector<2x8x8xf32>, vector<2x8x8xf32>, vector<2x8x8xf32>, vector<2x8x8xf32> -> vector<8x8x8xf32>
    %76 = arith.truncf %75 : vector<8x8x8xf32> to vector<8x8x8xbf16>
    "tpu.trace_start"() <{level = 10 : i32, message = "bqd,bkd->bqk"}> : () -> ()
    %cst_21 = arith.constant dense<0.000000e+00> : vector<8x8x8xf32>
    %77 = tpu.matmul %56, %66, %cst_21 {dimension_numbers = #tpu.dot_dimension_numbers<[2], [2], [1], [1], [0, 0, 0, 1, 1, 1], [0], [0]>} : vector<8x8x8xbf16>, vector<8x8x8xbf16>, vector<8x8x8xf32> -> vector<8x8x8xf32>
    "tpu.trace_stop"() : () -> ()
    %cst_22 = arith.constant 0.353553385 : f32
    %78 = vector.broadcast %cst_22 : f32 to vector<8x8x8xf32>
    %79 = arith.mulf %77, %78 : vector<8x8x8xf32>
    %cst_23 = arith.constant dense<0xFF800000> : vector<8x8xf32>
    %80 = vector.multi_reduction <maximumf>, %79, %cst_23 [2] : vector<8x8x8xf32> to vector<8x8xf32>
    %81 = vector.shape_cast %80 : vector<8x8xf32> to vector<8x8x1xf32>
    %82 = vector.broadcast %81 : vector<8x8x1xf32> to vector<8x8x8xf32>
    %83 = arith.subf %79, %82 : vector<8x8x8xf32>
    %84 = math.exp %83 : vector<8x8x8xf32>
    %cst_24 = arith.constant dense<0.000000e+00> : vector<8x8xf32>
    %85 = vector.multi_reduction <add>, %84, %cst_24 [2] : vector<8x8x8xf32> to vector<8x8xf32>
    %86 = vector.shape_cast %85 : vector<8x8xf32> to vector<8x8x1xf32>
    %87 = tpu.reciprocal %86 {approx = true} : vector<8x8x1xf32> -> vector<8x8x1xf32>
    %88 = vector.broadcast %87 : vector<8x8x1xf32> to vector<8x8x8xf32>
    %89 = arith.mulf %84, %88 : vector<8x8x8xf32>
    %90 = arith.truncf %89 : vector<8x8x8xf32> to vector<8x8x8xbf16>
    "tpu.trace_start"() <{level = 10 : i32, message = "bqk,bkd->bqd"}> : () -> ()
    %cst_25 = arith.constant dense<0.000000e+00> : vector<8x8x8xf32>
    %91 = tpu.matmul %90, %76, %cst_25 {dimension_numbers = #tpu.dot_dimension_numbers<[2], [1], [1], [2], [0, 0, 0, 1, 1, 2], [0], [0]>} : vector<8x8x8xbf16>, vector<8x8x8xbf16>, vector<8x8x8xf32> -> vector<8x8x8xf32>
    %cst_26 = arith.constant 0.000000e+00 : f32
    "tpu.trace_stop"() : () -> ()
    %92 = vector.broadcast %cst_26 : f32 to vector<16x32xf32>
    %93 = vector.extract_strided_slice %91 {offsets = [0, 0, 0], sizes = [2, 8, 8], strides = [1, 1, 1]} : vector<8x8x8xf32> to vector<2x8x8xf32>
    %94 = vector.shape_cast %93 : vector<2x8x8xf32> to vector<16x8xf32>
    %95 = arith.truncf %94 : vector<16x8xf32> to vector<16x8xbf16>
    %96 = vector.extract_strided_slice %38 {offsets = [0, 0], sizes = [8, 32], strides = [1, 1]} : vector<32x32xf32> to vector<8x32xf32>
    %97 = arith.truncf %96 : vector<8x32xf32> to vector<8x32xbf16>
    %cst_27 = arith.constant dense<0.000000e+00> : vector<16x32xf32>
    %98 = tpu.matmul %95, %97, %cst_27 {dimension_numbers = #tpu.dot_dimension_numbers<[1], [0], [0], [1], [0, 0, 1, 1], [], []>} : vector<16x8xbf16>, vector<8x32xbf16>, vector<16x32xf32> -> vector<16x32xf32>
    %99 = arith.addf %92, %98 : vector<16x32xf32>
    %100 = vector.extract_strided_slice %91 {offsets = [2, 0, 0], sizes = [2, 8, 8], strides = [1, 1, 1]} : vector<8x8x8xf32> to vector<2x8x8xf32>
    %101 = vector.shape_cast %100 : vector<2x8x8xf32> to vector<16x8xf32>
    %102 = arith.truncf %101 : vector<16x8xf32> to vector<16x8xbf16>
    %103 = vector.extract_strided_slice %38 {offsets = [8, 0], sizes = [8, 32], strides = [1, 1]} : vector<32x32xf32> to vector<8x32xf32>
    %104 = arith.truncf %103 : vector<8x32xf32> to vector<8x32xbf16>
    %cst_28 = arith.constant dense<0.000000e+00> : vector<16x32xf32>
    %105 = tpu.matmul %102, %104, %cst_28 {dimension_numbers = #tpu.dot_dimension_numbers<[1], [0], [0], [1], [0, 0, 1, 1], [], []>} : vector<16x8xbf16>, vector<8x32xbf16>, vector<16x32xf32> -> vector<16x32xf32>
    %106 = arith.addf %99, %105 : vector<16x32xf32>
    %107 = vector.extract_strided_slice %91 {offsets = [4, 0, 0], sizes = [2, 8, 8], strides = [1, 1, 1]} : vector<8x8x8xf32> to vector<2x8x8xf32>
    %108 = vector.shape_cast %107 : vector<2x8x8xf32> to vector<16x8xf32>
    %109 = arith.truncf %108 : vector<16x8xf32> to vector<16x8xbf16>
    %110 = vector.extract_strided_slice %38 {offsets = [16, 0], sizes = [8, 32], strides = [1, 1]} : vector<32x32xf32> to vector<8x32xf32>
    %111 = arith.truncf %110 : vector<8x32xf32> to vector<8x32xbf16>
    %cst_29 = arith.constant dense<0.000000e+00> : vector<16x32xf32>
    %112 = tpu.matmul %109, %111, %cst_29 {dimension_numbers = #tpu.dot_dimension_numbers<[1], [0], [0], [1], [0, 0, 1, 1], [], []>} : vector<16x8xbf16>, vector<8x32xbf16>, vector<16x32xf32> -> vector<16x32xf32>
    %113 = arith.addf %106, %112 : vector<16x32xf32>
    %114 = vector.extract_strided_slice %91 {offsets = [6, 0, 0], sizes = [2, 8, 8], strides = [1, 1, 1]} : vector<8x8x8xf32> to vector<2x8x8xf32>
    %115 = vector.shape_cast %114 : vector<2x8x8xf32> to vector<16x8xf32>
    %116 = arith.truncf %115 : vector<16x8xf32> to vector<16x8xbf16>
    %117 = vector.extract_strided_slice %38 {offsets = [24, 0], sizes = [8, 32], strides = [1, 1]} : vector<32x32xf32> to vector<8x32xf32>
    %118 = arith.truncf %117 : vector<8x32xf32> to vector<8x32xbf16>
    %cst_30 = arith.constant dense<0.000000e+00> : vector<16x32xf32>
    %119 = tpu.matmul %116, %118, %cst_30 {dimension_numbers = #tpu.dot_dimension_numbers<[1], [0], [0], [1], [0, 0, 1, 1], [], []>} : vector<16x8xbf16>, vector<8x32xbf16>, vector<16x32xf32> -> vector<16x32xf32>
    %120 = arith.addf %113, %119 : vector<16x32xf32>
    %121 = arith.addf %25, %120 : vector<16x32xf32>
    %cst_31 = arith.constant dense<0.000000e+00> : vector<32xf32>
    %122 = vector.multi_reduction <add>, %121, %cst_31 [0] : vector<16x32xf32> to vector<32xf32>
    %123 = vector.shape_cast %122 : vector<32xf32> to vector<1x32xf32>
    %124 = arith.mulf %121, %121 : vector<16x32xf32>
    %cst_32 = arith.constant dense<0.000000e+00> : vector<32xf32>
    %125 = vector.multi_reduction <add>, %124, %cst_32 [0] : vector<16x32xf32> to vector<32xf32>
    %126 = vector.shape_cast %125 : vector<32xf32> to vector<1x32xf32>
    %cst_33 = arith.constant 6.250000e-02 : f32
    %127 = vector.broadcast %cst_33 : f32 to vector<1x32xf32>
    %128 = arith.mulf %123, %127 : vector<1x32xf32>
    %cst_34 = arith.constant 6.250000e-02 : f32
    %129 = vector.broadcast %cst_34 : f32 to vector<1x32xf32>
    %130 = arith.mulf %126, %129 : vector<1x32xf32>
    %131 = arith.mulf %128, %128 : vector<1x32xf32>
    %132 = arith.subf %130, %131 : vector<1x32xf32>
    %cst_35 = arith.constant 0.000000e+00 : f32
    %133 = vector.broadcast %cst_35 : f32 to vector<1x32xf32>
    %134 = arith.maximumf %132, %133 : vector<1x32xf32>
    %cst_36 = arith.constant 9.99999974E-6 : f32
    %135 = vector.broadcast %cst_36 : f32 to vector<1x32xf32>
    %136 = arith.addf %134, %135 : vector<1x32xf32>
    %137 = math.rsqrt %136 : vector<1x32xf32>
    %138 = vector.broadcast %128 : vector<1x32xf32> to vector<16x32xf32>
    %139 = arith.subf %121, %138 : vector<16x32xf32>
    %140 = vector.broadcast %137 : vector<1x32xf32> to vector<16x32xf32>
    %141 = arith.mulf %139, %140 : vector<16x32xf32>
    %142 = vector.broadcast %28 : vector<1x32xf32> to vector<16x32xf32>
    %143 = arith.mulf %141, %142 : vector<16x32xf32>
    %144 = vector.broadcast %29 : vector<1x32xf32> to vector<16x32xf32>
    %145 = arith.addf %143, %144 : vector<16x32xf32>
    %146 = arith.truncf %145 : vector<16x32xf32> to vector<16x32xbf16>
    %cst_37 = arith.constant dense<0.000000e+00> : vector<16x64xf32>
    %147 = tpu.matmul %146, %41, %cst_37 {dimension_numbers = #tpu.dot_dimension_numbers<[1], [0], [0], [1], [0, 0, 1, 1], [], []>} : vector<16x32xbf16>, vector<32x64xbf16>, vector<16x64xf32> -> vector<16x64xf32>
    %148 = vector.broadcast %33 : vector<1x64xf32> to vector<16x64xf32>
    %149 = arith.addf %147, %148 : vector<16x64xf32>
    %cst_38 = arith.constant 0.000000e+00 : f32
    %150 = vector.broadcast %cst_38 : f32 to vector<16x64xf32>
    %151 = arith.maximumf %149, %150 : vector<16x64xf32>
    %152 = arith.truncf %151 : vector<16x64xf32> to vector<16x64xbf16>
    %cst_39 = arith.constant dense<0.000000e+00> : vector<16x32xf32>
    %153 = tpu.matmul %152, %44, %cst_39 {dimension_numbers = #tpu.dot_dimension_numbers<[1], [0], [0], [1], [0, 0, 1, 1], [], []>} : vector<16x64xbf16>, vector<64x32xbf16>, vector<16x32xf32> -> vector<16x32xf32>
    %154 = vector.broadcast %32 : vector<1x32xf32> to vector<16x32xf32>
    %155 = arith.addf %153, %154 : vector<16x32xf32>
    %156 = arith.addf %145, %155 : vector<16x32xf32>
    %cst_40 = arith.constant dense<0.000000e+00> : vector<32xf32>
    %157 = vector.multi_reduction <add>, %156, %cst_40 [0] : vector<16x32xf32> to vector<32xf32>
    %158 = vector.shape_cast %157 : vector<32xf32> to vector<1x32xf32>
    %159 = arith.mulf %156, %156 : vector<16x32xf32>
    %cst_41 = arith.constant dense<0.000000e+00> : vector<32xf32>
    %160 = vector.multi_reduction <add>, %159, %cst_41 [0] : vector<16x32xf32> to vector<32xf32>
    %161 = vector.shape_cast %160 : vector<32xf32> to vector<1x32xf32>
    %cst_42 = arith.constant 6.250000e-02 : f32
    %162 = vector.broadcast %cst_42 : f32 to vector<1x32xf32>
    %163 = arith.mulf %158, %162 : vector<1x32xf32>
    %cst_43 = arith.constant 6.250000e-02 : f32
    %164 = vector.broadcast %cst_43 : f32 to vector<1x32xf32>
    %165 = arith.mulf %161, %164 : vector<1x32xf32>
    %166 = arith.mulf %163, %163 : vector<1x32xf32>
    %167 = arith.subf %165, %166 : vector<1x32xf32>
    %cst_44 = arith.constant 0.000000e+00 : f32
    %168 = vector.broadcast %cst_44 : f32 to vector<1x32xf32>
    %169 = arith.maximumf %167, %168 : vector<1x32xf32>
    %cst_45 = arith.constant 9.99999974E-6 : f32
    %170 = vector.broadcast %cst_45 : f32 to vector<1x32xf32>
    %171 = arith.addf %169, %170 : vector<1x32xf32>
    %172 = math.rsqrt %171 : vector<1x32xf32>
    %173 = vector.broadcast %163 : vector<1x32xf32> to vector<16x32xf32>
    %174 = arith.subf %156, %173 : vector<16x32xf32>
    %175 = vector.broadcast %172 : vector<1x32xf32> to vector<16x32xf32>
    %176 = arith.mulf %174, %175 : vector<16x32xf32>
    %177 = vector.broadcast %30 : vector<1x32xf32> to vector<16x32xf32>
    %178 = arith.mulf %176, %177 : vector<16x32xf32>
    %179 = vector.broadcast %31 : vector<1x32xf32> to vector<16x32xf32>
    %180 = arith.addf %178, %179 : vector<16x32xf32>
    %c1 = arith.constant 1 : index
    %c0_46 = arith.constant 0 : index
    %c0_47 = arith.constant 0 : index
    %181 = vector.load %arg2[%c1, %c0_46, %c0_47] : memref<2x6x128xf32, #tpu.memory_space<vmem>>, vector<1x6x128xf32>
    %182 = vector.shape_cast %181 : vector<1x6x128xf32> to vector<6x128xf32>
    %183 = vector.extract_strided_slice %182 {offsets = [0, 0], sizes = [1, 32], strides = [1, 1]} : vector<6x128xf32> to vector<1x32xf32>
    %184 = vector.extract_strided_slice %182 {offsets = [1, 0], sizes = [1, 32], strides = [1, 1]} : vector<6x128xf32> to vector<1x32xf32>
    %185 = vector.extract_strided_slice %182 {offsets = [2, 0], sizes = [1, 32], strides = [1, 1]} : vector<6x128xf32> to vector<1x32xf32>
    %186 = vector.extract_strided_slice %182 {offsets = [3, 0], sizes = [1, 32], strides = [1, 1]} : vector<6x128xf32> to vector<1x32xf32>
    %187 = vector.extract_strided_slice %182 {offsets = [4, 0], sizes = [1, 32], strides = [1, 1]} : vector<6x128xf32> to vector<1x32xf32>
    %188 = vector.extract_strided_slice %182 {offsets = [5, 0], sizes = [1, 64], strides = [1, 1]} : vector<6x128xf32> to vector<1x64xf32>
    %c1_48 = arith.constant 1 : index
    %c0_49 = arith.constant 0 : index
    %c0_50 = arith.constant 0 : index
    %189 = vector.load %arg3[%c1_48, %c0_49, %c0_50] : memref<2x32x96xf32, #tpu.memory_space<vmem>>, vector<1x32x96xf32>
    %190 = vector.shape_cast %189 : vector<1x32x96xf32> to vector<32x96xf32>
    %191 = arith.truncf %190 : vector<32x96xf32> to vector<32x96xbf16>
    %c1_51 = arith.constant 1 : index
    %c0_52 = arith.constant 0 : index
    %c0_53 = arith.constant 0 : index
    %192 = vector.load %arg4[%c1_51, %c0_52, %c0_53] : memref<2x32x32xf32, #tpu.memory_space<vmem>>, vector<1x32x32xf32>
    %193 = vector.shape_cast %192 : vector<1x32x32xf32> to vector<32x32xf32>
    %c1_54 = arith.constant 1 : index
    %c0_55 = arith.constant 0 : index
    %c0_56 = arith.constant 0 : index
    %194 = vector.load %arg5[%c1_54, %c0_55, %c0_56] : memref<2x32x64xf32, #tpu.memory_space<vmem>>, vector<1x32x64xf32>
    %195 = vector.shape_cast %194 : vector<1x32x64xf32> to vector<32x64xf32>
    %196 = arith.truncf %195 : vector<32x64xf32> to vector<32x64xbf16>
    %c1_57 = arith.constant 1 : index
    %c0_58 = arith.constant 0 : index
    %c0_59 = arith.constant 0 : index
    %197 = vector.load %arg6[%c1_57, %c0_58, %c0_59] : memref<2x64x32xf32, #tpu.memory_space<vmem>>, vector<1x64x32xf32>
    %198 = vector.shape_cast %197 : vector<1x64x32xf32> to vector<64x32xf32>
    %199 = arith.truncf %198 : vector<64x32xf32> to vector<64x32xbf16>
    %200 = arith.truncf %180 : vector<16x32xf32> to vector<16x32xbf16>
    %cst_60 = arith.constant dense<0.000000e+00> : vector<16x96xf32>
    %201 = tpu.matmul %200, %191, %cst_60 {dimension_numbers = #tpu.dot_dimension_numbers<[1], [0], [0], [1], [0, 0, 1, 1], [], []>} : vector<16x32xbf16>, vector<32x96xbf16>, vector<16x96xf32> -> vector<16x96xf32>
    %202 = vector.extract_strided_slice %201 {offsets = [0, 0], sizes = [16, 8], strides = [1, 1]} : vector<16x96xf32> to vector<16x8xf32>
    %203 = vector.shape_cast %202 : vector<16x8xf32> to vector<2x8x8xf32>
    %204 = vector.extract_strided_slice %201 {offsets = [0, 8], sizes = [16, 8], strides = [1, 1]} : vector<16x96xf32> to vector<16x8xf32>
    %205 = vector.shape_cast %204 : vector<16x8xf32> to vector<2x8x8xf32>
    %206 = vector.extract_strided_slice %201 {offsets = [0, 16], sizes = [16, 8], strides = [1, 1]} : vector<16x96xf32> to vector<16x8xf32>
    %207 = vector.shape_cast %206 : vector<16x8xf32> to vector<2x8x8xf32>
    %208 = vector.extract_strided_slice %201 {offsets = [0, 24], sizes = [16, 8], strides = [1, 1]} : vector<16x96xf32> to vector<16x8xf32>
    %209 = vector.shape_cast %208 : vector<16x8xf32> to vector<2x8x8xf32>
    %210 = tpu.concatenate %203, %205, %207, %209 in 0 : vector<2x8x8xf32>, vector<2x8x8xf32>, vector<2x8x8xf32>, vector<2x8x8xf32> -> vector<8x8x8xf32>
    %211 = arith.truncf %210 : vector<8x8x8xf32> to vector<8x8x8xbf16>
    %212 = vector.extract_strided_slice %201 {offsets = [0, 32], sizes = [16, 8], strides = [1, 1]} : vector<16x96xf32> to vector<16x8xf32>
    %213 = vector.shape_cast %212 : vector<16x8xf32> to vector<2x8x8xf32>
    %214 = vector.extract_strided_slice %201 {offsets = [0, 40], sizes = [16, 8], strides = [1, 1]} : vector<16x96xf32> to vector<16x8xf32>
    %215 = vector.shape_cast %214 : vector<16x8xf32> to vector<2x8x8xf32>
    %216 = vector.extract_strided_slice %201 {offsets = [0, 48], sizes = [16, 8], strides = [1, 1]} : vector<16x96xf32> to vector<16x8xf32>
    %217 = vector.shape_cast %216 : vector<16x8xf32> to vector<2x8x8xf32>
    %218 = vector.extract_strided_slice %201 {offsets = [0, 56], sizes = [16, 8], strides = [1, 1]} : vector<16x96xf32> to vector<16x8xf32>
    %219 = vector.shape_cast %218 : vector<16x8xf32> to vector<2x8x8xf32>
    %220 = tpu.concatenate %213, %215, %217, %219 in 0 : vector<2x8x8xf32>, vector<2x8x8xf32>, vector<2x8x8xf32>, vector<2x8x8xf32> -> vector<8x8x8xf32>
    %221 = arith.truncf %220 : vector<8x8x8xf32> to vector<8x8x8xbf16>
    %222 = vector.extract_strided_slice %201 {offsets = [0, 64], sizes = [16, 8], strides = [1, 1]} : vector<16x96xf32> to vector<16x8xf32>
    %223 = vector.shape_cast %222 : vector<16x8xf32> to vector<2x8x8xf32>
    %224 = vector.extract_strided_slice %201 {offsets = [0, 72], sizes = [16, 8], strides = [1, 1]} : vector<16x96xf32> to vector<16x8xf32>
    %225 = vector.shape_cast %224 : vector<16x8xf32> to vector<2x8x8xf32>
    %226 = vector.extract_strided_slice %201 {offsets = [0, 80], sizes = [16, 8], strides = [1, 1]} : vector<16x96xf32> to vector<16x8xf32>
    %227 = vector.shape_cast %226 : vector<16x8xf32> to vector<2x8x8xf32>
    %228 = vector.extract_strided_slice %201 {offsets = [0, 88], sizes = [16, 8], strides = [1, 1]} : vector<16x96xf32> to vector<16x8xf32>
    %229 = vector.shape_cast %228 : vector<16x8xf32> to vector<2x8x8xf32>
    %230 = tpu.concatenate %223, %225, %227, %229 in 0 : vector<2x8x8xf32>, vector<2x8x8xf32>, vector<2x8x8xf32>, vector<2x8x8xf32> -> vector<8x8x8xf32>
    %231 = arith.truncf %230 : vector<8x8x8xf32> to vector<8x8x8xbf16>
    "tpu.trace_start"() <{level = 10 : i32, message = "bqd,bkd->bqk"}> : () -> ()
    %cst_61 = arith.constant dense<0.000000e+00> : vector<8x8x8xf32>
    %232 = tpu.matmul %211, %221, %cst_61 {dimension_numbers = #tpu.dot_dimension_numbers<[2], [2], [1], [1], [0, 0, 0, 1, 1, 1], [0], [0]>} : vector<8x8x8xbf16>, vector<8x8x8xbf16>, vector<8x8x8xf32> -> vector<8x8x8xf32>
    "tpu.trace_stop"() : () -> ()
    %cst_62 = arith.constant 0.353553385 : f32
    %233 = vector.broadcast %cst_62 : f32 to vector<8x8x8xf32>
    %234 = arith.mulf %232, %233 : vector<8x8x8xf32>
    %cst_63 = arith.constant dense<0xFF800000> : vector<8x8xf32>
    %235 = vector.multi_reduction <maximumf>, %234, %cst_63 [2] : vector<8x8x8xf32> to vector<8x8xf32>
    %236 = vector.shape_cast %235 : vector<8x8xf32> to vector<8x8x1xf32>
    %237 = vector.broadcast %236 : vector<8x8x1xf32> to vector<8x8x8xf32>
    %238 = arith.subf %234, %237 : vector<8x8x8xf32>
    %239 = math.exp %238 : vector<8x8x8xf32>
    %cst_64 = arith.constant dense<0.000000e+00> : vector<8x8xf32>
    %240 = vector.multi_reduction <add>, %239, %cst_64 [2] : vector<8x8x8xf32> to vector<8x8xf32>
    %241 = vector.shape_cast %240 : vector<8x8xf32> to vector<8x8x1xf32>
    %242 = tpu.reciprocal %241 {approx = true} : vector<8x8x1xf32> -> vector<8x8x1xf32>
    %243 = vector.broadcast %242 : vector<8x8x1xf32> to vector<8x8x8xf32>
    %244 = arith.mulf %239, %243 : vector<8x8x8xf32>
    %245 = arith.truncf %244 : vector<8x8x8xf32> to vector<8x8x8xbf16>
    "tpu.trace_start"() <{level = 10 : i32, message = "bqk,bkd->bqd"}> : () -> ()
    %cst_65 = arith.constant dense<0.000000e+00> : vector<8x8x8xf32>
    %246 = tpu.matmul %245, %231, %cst_65 {dimension_numbers = #tpu.dot_dimension_numbers<[2], [1], [1], [2], [0, 0, 0, 1, 1, 2], [0], [0]>} : vector<8x8x8xbf16>, vector<8x8x8xbf16>, vector<8x8x8xf32> -> vector<8x8x8xf32>
    %cst_66 = arith.constant 0.000000e+00 : f32
    "tpu.trace_stop"() : () -> ()
    %247 = vector.broadcast %cst_66 : f32 to vector<16x32xf32>
    %248 = vector.extract_strided_slice %246 {offsets = [0, 0, 0], sizes = [2, 8, 8], strides = [1, 1, 1]} : vector<8x8x8xf32> to vector<2x8x8xf32>
    %249 = vector.shape_cast %248 : vector<2x8x8xf32> to vector<16x8xf32>
    %250 = arith.truncf %249 : vector<16x8xf32> to vector<16x8xbf16>
    %251 = vector.extract_strided_slice %193 {offsets = [0, 0], sizes = [8, 32], strides = [1, 1]} : vector<32x32xf32> to vector<8x32xf32>
    %252 = arith.truncf %251 : vector<8x32xf32> to vector<8x32xbf16>
    %cst_67 = arith.constant dense<0.000000e+00> : vector<16x32xf32>
    %253 = tpu.matmul %250, %252, %cst_67 {dimension_numbers = #tpu.dot_dimension_numbers<[1], [0], [0], [1], [0, 0, 1, 1], [], []>} : vector<16x8xbf16>, vector<8x32xbf16>, vector<16x32xf32> -> vector<16x32xf32>
    %254 = arith.addf %247, %253 : vector<16x32xf32>
    %255 = vector.extract_strided_slice %246 {offsets = [2, 0, 0], sizes = [2, 8, 8], strides = [1, 1, 1]} : vector<8x8x8xf32> to vector<2x8x8xf32>
    %256 = vector.shape_cast %255 : vector<2x8x8xf32> to vector<16x8xf32>
    %257 = arith.truncf %256 : vector<16x8xf32> to vector<16x8xbf16>
    %258 = vector.extract_strided_slice %193 {offsets = [8, 0], sizes = [8, 32], strides = [1, 1]} : vector<32x32xf32> to vector<8x32xf32>
    %259 = arith.truncf %258 : vector<8x32xf32> to vector<8x32xbf16>
    %cst_68 = arith.constant dense<0.000000e+00> : vector<16x32xf32>
    %260 = tpu.matmul %257, %259, %cst_68 {dimension_numbers = #tpu.dot_dimension_numbers<[1], [0], [0], [1], [0, 0, 1, 1], [], []>} : vector<16x8xbf16>, vector<8x32xbf16>, vector<16x32xf32> -> vector<16x32xf32>
    %261 = arith.addf %254, %260 : vector<16x32xf32>
    %262 = vector.extract_strided_slice %246 {offsets = [4, 0, 0], sizes = [2, 8, 8], strides = [1, 1, 1]} : vector<8x8x8xf32> to vector<2x8x8xf32>
    %263 = vector.shape_cast %262 : vector<2x8x8xf32> to vector<16x8xf32>
    %264 = arith.truncf %263 : vector<16x8xf32> to vector<16x8xbf16>
    %265 = vector.extract_strided_slice %193 {offsets = [16, 0], sizes = [8, 32], strides = [1, 1]} : vector<32x32xf32> to vector<8x32xf32>
    %266 = arith.truncf %265 : vector<8x32xf32> to vector<8x32xbf16>
    %cst_69 = arith.constant dense<0.000000e+00> : vector<16x32xf32>
    %267 = tpu.matmul %264, %266, %cst_69 {dimension_numbers = #tpu.dot_dimension_numbers<[1], [0], [0], [1], [0, 0, 1, 1], [], []>} : vector<16x8xbf16>, vector<8x32xbf16>, vector<16x32xf32> -> vector<16x32xf32>
    %268 = arith.addf %261, %267 : vector<16x32xf32>
    %269 = vector.extract_strided_slice %246 {offsets = [6, 0, 0], sizes = [2, 8, 8], strides = [1, 1, 1]} : vector<8x8x8xf32> to vector<2x8x8xf32>
    %270 = vector.shape_cast %269 : vector<2x8x8xf32> to vector<16x8xf32>
    %271 = arith.truncf %270 : vector<16x8xf32> to vector<16x8xbf16>
    %272 = vector.extract_strided_slice %193 {offsets = [24, 0], sizes = [8, 32], strides = [1, 1]} : vector<32x32xf32> to vector<8x32xf32>
    %273 = arith.truncf %272 : vector<8x32xf32> to vector<8x32xbf16>
    %cst_70 = arith.constant dense<0.000000e+00> : vector<16x32xf32>
    %274 = tpu.matmul %271, %273, %cst_70 {dimension_numbers = #tpu.dot_dimension_numbers<[1], [0], [0], [1], [0, 0, 1, 1], [], []>} : vector<16x8xbf16>, vector<8x32xbf16>, vector<16x32xf32> -> vector<16x32xf32>
    %275 = arith.addf %268, %274 : vector<16x32xf32>
    %276 = arith.addf %180, %275 : vector<16x32xf32>
    %cst_71 = arith.constant dense<0.000000e+00> : vector<32xf32>
    %277 = vector.multi_reduction <add>, %276, %cst_71 [0] : vector<16x32xf32> to vector<32xf32>
    %278 = vector.shape_cast %277 : vector<32xf32> to vector<1x32xf32>
    %279 = arith.mulf %276, %276 : vector<16x32xf32>
    %cst_72 = arith.constant dense<0.000000e+00> : vector<32xf32>
    %280 = vector.multi_reduction <add>, %279, %cst_72 [0] : vector<16x32xf32> to vector<32xf32>
    %281 = vector.shape_cast %280 : vector<32xf32> to vector<1x32xf32>
    %cst_73 = arith.constant 6.250000e-02 : f32
    %282 = vector.broadcast %cst_73 : f32 to vector<1x32xf32>
    %283 = arith.mulf %278, %282 : vector<1x32xf32>
    %cst_74 = arith.constant 6.250000e-02 : f32
    %284 = vector.broadcast %cst_74 : f32 to vector<1x32xf32>
    %285 = arith.mulf %281, %284 : vector<1x32xf32>
    %286 = arith.mulf %283, %283 : vector<1x32xf32>
    %287 = arith.subf %285, %286 : vector<1x32xf32>
    %cst_75 = arith.constant 0.000000e+00 : f32
    %288 = vector.broadcast %cst_75 : f32 to vector<1x32xf32>
    %289 = arith.maximumf %287, %288 : vector<1x32xf32>
    %cst_76 = arith.constant 9.99999974E-6 : f32
    %290 = vector.broadcast %cst_76 : f32 to vector<1x32xf32>
    %291 = arith.addf %289, %290 : vector<1x32xf32>
    %292 = math.rsqrt %291 : vector<1x32xf32>
    %293 = vector.broadcast %283 : vector<1x32xf32> to vector<16x32xf32>
    %294 = arith.subf %276, %293 : vector<16x32xf32>
    %295 = vector.broadcast %292 : vector<1x32xf32> to vector<16x32xf32>
    %296 = arith.mulf %294, %295 : vector<16x32xf32>
    %297 = vector.broadcast %183 : vector<1x32xf32> to vector<16x32xf32>
    %298 = arith.mulf %296, %297 : vector<16x32xf32>
    %299 = vector.broadcast %184 : vector<1x32xf32> to vector<16x32xf32>
    %300 = arith.addf %298, %299 : vector<16x32xf32>
    %301 = arith.truncf %300 : vector<16x32xf32> to vector<16x32xbf16>
    %cst_77 = arith.constant dense<0.000000e+00> : vector<16x64xf32>
    %302 = tpu.matmul %301, %196, %cst_77 {dimension_numbers = #tpu.dot_dimension_numbers<[1], [0], [0], [1], [0, 0, 1, 1], [], []>} : vector<16x32xbf16>, vector<32x64xbf16>, vector<16x64xf32> -> vector<16x64xf32>
    %303 = vector.broadcast %188 : vector<1x64xf32> to vector<16x64xf32>
    %304 = arith.addf %302, %303 : vector<16x64xf32>
    %cst_78 = arith.constant 0.000000e+00 : f32
    %305 = vector.broadcast %cst_78 : f32 to vector<16x64xf32>
    %306 = arith.maximumf %304, %305 : vector<16x64xf32>
    %307 = arith.truncf %306 : vector<16x64xf32> to vector<16x64xbf16>
    %cst_79 = arith.constant dense<0.000000e+00> : vector<16x32xf32>
    %308 = tpu.matmul %307, %199, %cst_79 {dimension_numbers = #tpu.dot_dimension_numbers<[1], [0], [0], [1], [0, 0, 1, 1], [], []>} : vector<16x64xbf16>, vector<64x32xbf16>, vector<16x32xf32> -> vector<16x32xf32>
    %309 = vector.broadcast %187 : vector<1x32xf32> to vector<16x32xf32>
    %310 = arith.addf %308, %309 : vector<16x32xf32>
    %311 = arith.addf %300, %310 : vector<16x32xf32>
    %cst_80 = arith.constant dense<0.000000e+00> : vector<32xf32>
    %312 = vector.multi_reduction <add>, %311, %cst_80 [0] : vector<16x32xf32> to vector<32xf32>
    %313 = vector.shape_cast %312 : vector<32xf32> to vector<1x32xf32>
    %314 = arith.mulf %311, %311 : vector<16x32xf32>
    %cst_81 = arith.constant dense<0.000000e+00> : vector<32xf32>
    %315 = vector.multi_reduction <add>, %314, %cst_81 [0] : vector<16x32xf32> to vector<32xf32>
    %316 = vector.shape_cast %315 : vector<32xf32> to vector<1x32xf32>
    %cst_82 = arith.constant 6.250000e-02 : f32
    %317 = vector.broadcast %cst_82 : f32 to vector<1x32xf32>
    %318 = arith.mulf %313, %317 : vector<1x32xf32>
    %cst_83 = arith.constant 6.250000e-02 : f32
    %319 = vector.broadcast %cst_83 : f32 to vector<1x32xf32>
    %320 = arith.mulf %316, %319 : vector<1x32xf32>
    %321 = arith.mulf %318, %318 : vector<1x32xf32>
    %322 = arith.subf %320, %321 : vector<1x32xf32>
    %cst_84 = arith.constant 0.000000e+00 : f32
    %323 = vector.broadcast %cst_84 : f32 to vector<1x32xf32>
    %324 = arith.maximumf %322, %323 : vector<1x32xf32>
    %cst_85 = arith.constant 9.99999974E-6 : f32
    %325 = vector.broadcast %cst_85 : f32 to vector<1x32xf32>
    %326 = arith.addf %324, %325 : vector<1x32xf32>
    %327 = math.rsqrt %326 : vector<1x32xf32>
    %328 = vector.broadcast %318 : vector<1x32xf32> to vector<16x32xf32>
    %329 = arith.subf %311, %328 : vector<16x32xf32>
    %330 = vector.broadcast %327 : vector<1x32xf32> to vector<16x32xf32>
    %331 = arith.mulf %329, %330 : vector<16x32xf32>
    %332 = vector.broadcast %185 : vector<1x32xf32> to vector<16x32xf32>
    %333 = arith.mulf %331, %332 : vector<16x32xf32>
    %334 = vector.broadcast %186 : vector<1x32xf32> to vector<16x32xf32>
    %335 = arith.addf %333, %334 : vector<16x32xf32>
    %c0_86 = arith.constant 0 : index
    %c0_87 = arith.constant 0 : index
    %336 = vector.load %arg7[%c0_86, %c0_87] : memref<16x32xf32, #tpu.memory_space<vmem>>, vector<16x32xf32>
    tpu.vector_store %arg7[%c0_86, %c0_87], %335 {strides = array<i32>} : memref<16x32xf32, #tpu.memory_space<vmem>>, vector<16x32xf32>,
    %337 = vector.shape_cast %335 : vector<16x32xf32> to vector<2x8x32xf32>
    %cst_88 = arith.constant dense<0.000000e+00> : vector<2x32xf32>
    %338 = vector.multi_reduction <add>, %337, %cst_88 [1] : vector<2x8x32xf32> to vector<2x32xf32>
    %cst_89 = arith.constant 8.000000e+00 : f32
    %339 = vector.broadcast %cst_89 : f32 to vector<2x32xf32>
    %340 = arith.divf %338, %339 : vector<2x32xf32>
    %c0_90 = arith.constant 0 : index
    %c0_91 = arith.constant 0 : index
    %341 = vector.load %arg8[%c0_90, %c0_91] : memref<2x32xf32, #tpu.memory_space<vmem>>, vector<2x32xf32>
    tpu.vector_store %arg8[%c0_90, %c0_91], %340 {strides = array<i32>} : memref<2x32xf32, #tpu.memory_space<vmem>>, vector<2x32xf32>,
    return
  }
}

</mosaic_0001>

<bundles_post_ra>
// kernel: am_pre_actor_forward.1
= control target key start
LH: loop header
LB: loop body
LE: loop exit
PB: predicated region body
PF: predicated region fallthrough
CT: control target
= control target key end

     0   :  { %14 = vsyncpa [#allocation3], 0  ;;  %vm46_vm0 = vcmask 1041408   ;;  %v3703_v3 = vmov 0.0   ;;  %vm3704_vm1 = vmmov 0   ;;  %vm41_vm2 = vcmask 1041409   ;;  %s4455_s0 = inlined_call_operand.vmem [shape: f32[2,8,3], index: 0, kind: input, shape index: {}]   ;;  %s4456_s1 = inlined_call_operand.vmem [shape: f32[8,32], index: 1, kind: input, shape index: {}]   ;;  %s4457_s2 = inlined_call_operand.vmem [shape: f32[2,6,128], index: 2, kind: input, shape index: {}]   ;;  %s4458_s3 = inlined_call_operand.vmem [shape: f32[2,32,96], index: 3, kind: input, shape index: {}]   ;;  %s4459_s4 = inlined_call_operand.vmem [shape: f32[2,32,32], index: 4, kind: input, shape index: {}]   ;;  %s4460_s5 = inlined_call_operand.vmem [shape: f32[2,32,64], index: 5, kind: input, shape index: {}]   ;;  %s4461_s6 = inlined_call_operand.vmem [shape: f32[2,64,32], index: 6, kind: input, shape index: {}]   ;;  %s4462_s7 = inlined_call_operand.hbm [shape: f32[16,32], index: 7, kind: output, shape index: {0}]   ;;  %s4463_s8 = inlined_call_operand.hbm [shape: f32[2,32], index: 8, kind: output, shape index: {1}]  }
   0x1   :  { %v33_v0 = vld [vmem:[%s4456_s1] sm:$0xff]  ;;  %v32_v2 = vld [vmem:[%s4455_s0 + $0x8] sm:$0xff]  ;;  %3235 = vmatprep.subr.mxu0 %v3703_v3  ;;  %3237 = vmatprep.mubr.msk.f32.mxu0 %vm3704_vm1, %v3703_v3  ;;  %vm43_vm3 = vcmask 15360  }
   0x2   :  { %v31_v1 = vld [vmem:[%s4455_s0] sm:$0xff]  ;;  %v40_v4 = vrot.slane %v32_v2, 7  ;;  %v124_v5 = vrot.slane %v33_v0, 2 }
   0x3   :  { %15 = vsyncpa [#allocation5], 0  ;;  %3236 = vmatpush3.msk.msra.mxu0 %vm46_vm0, %v33_v0  ;;  %vm130_vm4 = vcmask 1042432   ;;  %vm125_vm5 = vcmask 23552   ;;  %v249_v7 = vld [vmem:[%s4458_s3] sm:$0xff]  ;;  %v250_v8 = vld [vmem:[%s4458_s3 + $0x8] sm:$0xff]  ;;  %v34_v13 = vlaneseq }
   0x4   :  { %v42_v6 = vsel %vm41_vm2, %v40_v4, %v31_v1  ;;  %3240 = vmatprep.subr.msk.mxu1 %vm130_vm4, %v124_v5  ;;  %3242 = vmatprep.mubr.msk.f32.mxu1 %vm125_vm5, %v31_v1  ;;  %v253_v9 = vpack.c.bf16 %v250_v8, %v249_v7  ;;  %v251_v10 = vld [vmem:[%s4458_s3 + $0x10] sm:$0xff]  ;;  %v252_v11 = vld [vmem:[%s4458_s3 + $0x18] sm:$0xff]  ;;  %v3705_v15 = vmov 1966171168   ;;  %vm278_vm7 = vcmask 261120   ;;  %s3706_s17 = smov 104  }
   0x5   :  { %3238 = vmatmul.mubr.msk.f32.vlgmr.msra.gmra.mrb[0].mxu0 %vm43_vm3, %v42_v6  ;;  %3241 = vmatpush3.msk.msra.mxu1 %vm130_vm4, %v124_v5  ;;  %v254_v12 = vpack.c.bf16 %v252_v11, %v251_v10  ;;  %v3793_v14 = vshrl.u32 %v34_v13, 7  ;;  %v213_v16 = vunpack.c.l.s4 %v3705_v15  ;;  %s3707_s18 = smov 120   ;;  %s3708_s19 = smov 96   ;;  %vm354_vm8 = vcmask 64512  }
   0x6   :  { %3243 = vmatmul.mubr.msk.f32.vlgmr.msra.gmra.mrb[0].mxu1 %vm125_vm5, %v32_v2  ;;  %3245 = vmatprep.subr.bf16.mxu1 %v3703_v3  ;;  %s3709_s20 = smov 112   ;;  %s3710_s21 = smov 64   ;;  %vm853_vm9 = vcmask 1043456   ;;  %vm1534_vm10 = vcmask 523264  }
   0x7   :  { %3249 = vmatprep.mubr.msk.bf16.mxu1 %vm3704_vm1, %v3703_v3  ;;  %3259 = vmatprep.subr.bf16.mxu0 %v3703_v3  ;;  %v3796_v17 = vsub.s32 5, %v3793_v14  ;;  %v214_v18 = vunpack.c.0.s8 %v213_v16  ;;  %v122_v20 = vsub.s32 6, %v3793_v14  ;;  %v3802_v29 = vsub.s32 0, %v3793_v14 }
   0x8   :  { %3261 = vmatprep.mubr.msk.bf16.mxu0 %vm3704_vm1, %v3703_v3  ;;  %3246 = vmatpush3.bf16.msra.mxu1 %v253_v9  ;;  %vm210_vm6 = vcmp.eq.s32.totalorder %v3793_v14, 0 }
   0x9   :  { %3247 = vmatprep.subr.bf16.mxu1 %v3703_v3  ;;  %v37_v19 = vrot.slane %v33_v0, %v3796_v17  ;;  %v217_v21 = vsub.s32 %v214_v18, %v3793_v14  ;;  %v123_v25 = vrot.slane %v33_v0, %v122_v20 }
   0xc   :  { %3248 = vmatpush3.bf16.msra.mxu1 %v254_v12 }
   0xd   :  { %3253 = vmatprep.subr.bf16.mxu1 %v3703_v3 }
  0xd8   :  { %v116_v22 = vpop.f32.mrb[0].mxu0 }
  0xd9   :  { %v117_v23 = vadd.f32 %v116_v22, %v37_v19  ;;  %v3239_v24 = vpop.f32.mrb[1].mxu0  ;;  %v3244_v26 = vpop.f32.mrb[0].mxu1 }
  0xda   :  { %v199_v27 = vpop.f32.mrb[1].mxu1  ;;  %v205_v35 = vadd.f32 %v3244_v26, %v123_v25 }
  0xdb   :  { %v218_v28 = vrot.slane %v117_v23, %v217_v21  ;;  %v200_v32 = vadd.f32 %v199_v27, %v123_v25 }
  0xdd   :  { %v219_v30 = vcombine.high %v218_v28, %v218_v28  ;;  %v226_v31 = vrot.slane %v218_v28, %v217_v21 }
  0xdf   :  { %v233_v33 = vrot.slane %v219_v30, %v217_v21  ;;  %v239_v34 = vrot.slane %v226_v31, %v3802_v29 }
  0xe1   :  { %v243_v36 = vrot.slane %v233_v33, %v3802_v29  ;;  %v3807_v37 = vsel %vm210_vm6, %v239_v34, %v200_v32 }
  0xe3   :  { %v3809_v38 = vsel %vm210_vm6, %v243_v36, %v205_v35 }
  0xe4   :  { %v277_v39 = vpack.c.bf16 %v3809_v38, %v3807_v37 }
  0xe6   :  { %3250 = vmatmul.mubr.msk.bf16.vlgmr.msra.gmra.mrb[4].mxu1 %vm278_vm7, %v277_v39 }
  0xe7   :  { %3255 = vmatprep.mubr.msk.bf16.mxu1 %vm3704_vm1, %v3703_v3 }
 0x1b9   :  { %v316_v40 = vpop.f32.mrb[4].mxu1 }
 0x1ba   :  { %v3251_v41 = vpop.f32.mrb[5].mxu1  ;;  %v343_v45 = vpack.c.bf16 %v316_v40, %v316_v40 }
 0x1bb   :  { %v319_v42 = vpop.f32.mrb[6].mxu1 }
 0x1bc   :  { %v3252_v43 = vpop.f32.mrb[7].mxu1  ;;  %v3563_v44 = vpack.i.bf16 %v319_v42, %v316_v40  ;;  %v344_v46 = vpack.c.bf16 %v319_v42, %v319_v42 }
 0x1be   :  { %3564 = vrot.lane.b32.xlu1 %v3563_v44, %s3706_s17  ;;  %3554 = vrot.lane.b32.xlu0 %v3563_v44, %s3707_s18 }
 0x1c2   :  { %352 = vrot.lane.b32.xlu1 %v343_v45, %s3708_s19  ;;  %3559 = vrot.lane.b32.xlu0 %v3563_v44, %s3709_s20 }
 0x1c6   :  { %402 = vrot.lane.b32.xlu0 %v344_v46, %s3708_s19 }
 0x230   :  { %v3565_v47 = vpop.permute.xlu1 %3564  ;;  %v3555_v48 = vpop.permute.xlu0 %3554 }
 0x231   :  { %v3557_v49 = vunpack.i.h.bf16 %v3555_v48  ;;  %v3556_v50 = vunpack.i.l.bf16 %v3555_v48  ;;  %v3566_v58 = vunpack.i.l.bf16 %v3565_v47  ;;  %v3567_v61 = vunpack.i.h.bf16 %v3565_v47 }
 0x233   :  { %v3821_v51 = vpack.c.bf16 %v3557_v49, %v3557_v49  ;;  %v3823_v52 = vpack.c.bf16 %v3556_v50, %v3556_v50  ;;  %v3840_v0 = vpack.c.bf16 %v3566_v58, %v3566_v58  ;;  %v3843_v1 = vpack.c.bf16 %v3567_v61, %v3567_v61 }
 0x234   :  { %v353_v53 = vpop.permute.xlu1 %352  ;;  %v3560_v54 = vpop.permute.xlu0 %3559 }
 0x235   :  { %v359_v55 = vsel %vm354_vm8, %v353_v53, 0  ;;  %v3562_v56 = vunpack.i.h.bf16 %v3560_v54  ;;  %v3561_v57 = vunpack.i.l.bf16 %v3560_v54  ;;  %451 = vrot.lane.b32.xlu1 %v3823_v52, %s3708_s19  ;;  %500 = vrot.lane.b32.xlu0 %v3821_v51, %s3708_s19 }
 0x236   :  { %3254 = vmatpush3.bf16.xpose.msra.mxu1 %v359_v55 }
 0x237   :  { %v3830_v59 = vpack.c.bf16 %v3562_v56, %v3562_v56  ;;  %v3832_v60 = vpack.c.bf16 %v3561_v57, %v3561_v57  ;;  %3265 = vmatprep.subr.bf16.mxu1 %v3703_v3 }
 0x238   :  { %v403_v62 = vpop.permute.xlu0 %402 }
 0x239   :  { %v408_v63 = vsel %vm354_vm8, %v403_v62, 0  ;;  %549 = vrot.lane.b32.xlu1 %v3832_v60, %s3708_s19  ;;  %598 = vrot.lane.b32.xlu0 %v3830_v59, %s3708_s19 }
 0x23a   :  { %3260 = vmatpush3.bf16.xpose.msra.mxu0 %v408_v63 }
 0x23b   :  { %3271 = vmatprep.subr.bf16.mxu0 %v3703_v3 }
 0x23d   :  { %3256 = vmatmul.mubr.msk.bf16.vlgmr.msra.gmra.mrb[8].mxu1 %vm354_vm8, %v343_v45  ;;  %647 = vrot.lane.b32.xlu1 %v3840_v0, %s3708_s19 }
 0x23e   :  { %696 = vrot.lane.b32.xlu0 %v3843_v1, %s3708_s19  ;;  %3267 = vmatprep.mubr.msk.bf16.mxu1 %vm3704_vm1, %v3703_v3 }
 0x241   :  { %897 = vrot.lane.b32.xlu1 %v344_v46, %s3710_s21  ;;  %3262 = vmatmul.mubr.msk.bf16.vlgmr.msra.gmra.mrb[4].mxu0 %vm354_vm8, %v344_v46 }
 0x242   :  { %848 = vrot.lane.b32.xlu0 %v343_v45, %s3710_s21  ;;  %3273 = vmatprep.mubr.msk.bf16.mxu0 %vm3704_vm1, %v3703_v3 }
 0x2a7   :  { %v452_v2 = vpop.permute.xlu1 %451  ;;  %v501_v4 = vpop.permute.xlu0 %500 }
 0x2a8   :  { %v457_v5 = vsel %vm354_vm8, %v452_v2, 0  ;;  %v506_v6 = vsel %vm354_vm8, %v501_v4, 0 }
 0x2a9   :  { %3266 = vmatpush3.bf16.xpose.msra.mxu1 %v457_v5  ;;  %3272 = vmatpush3.bf16.xpose.msra.mxu0 %v506_v6 }
 0x2aa   :  { %3277 = vmatprep.subr.bf16.mxu1 %v3703_v3  ;;  %3283 = vmatprep.subr.bf16.mxu0 %v3703_v3 }
 0x2ab   :  { %v550_v7 = vpop.permute.xlu1 %549  ;;  %v599_v8 = vpop.permute.xlu0 %598 }
 0x2ac   :  { %v555_v9 = vsel %vm354_vm8, %v550_v7, 0  ;;  %v604_v10 = vsel %vm354_vm8, %v599_v8, 0 }
 0x2af   :  { %v648_v11 = vpop.permute.xlu1 %647 }
 0x2b0   :  { %3268 = vmatmul.mubr.msk.bf16.vlgmr.msra.gmra.mrb[12].mxu1 %vm354_vm8, %v3823_v52  ;;  %3274 = vmatmul.mubr.msk.bf16.vlgmr.msra.gmra.mrb[8].mxu0 %vm354_vm8, %v3821_v51  ;;  %v697_v12 = vpop.permute.xlu0 %696  ;;  %v653_v13 = vsel %vm354_vm8, %v648_v11, 0 }
 0x2b1   :  { %3278 = vmatpush3.bf16.xpose.msra.mxu1 %v555_v9  ;;  %3284 = vmatpush3.bf16.xpose.msra.mxu0 %v604_v10  ;;  %v702_v15 = vsel %vm354_vm8, %v697_v12, 0 }
 0x2b2   :  { %3279 = vmatprep.mubr.msk.bf16.mxu1 %vm3704_vm1, %v3703_v3  ;;  %3285 = vmatprep.mubr.msk.bf16.mxu0 %vm3704_vm1, %v3703_v3 }
 0x2b3   :  { %3289 = vmatprep.subr.bf16.mxu1 %v3703_v3  ;;  %3295 = vmatprep.subr.bf16.mxu0 %v3703_v3  ;;  %v898_v16 = vpop.permute.xlu1 %897 }
 0x2b4   :  { %v849_v18 = vpop.permute.xlu0 %848  ;;  %v903_v19 = vsel %vm853_vm9, %v898_v16, 0 }
 0x2b5   :  { %v855_v20 = vsel %vm853_vm9, %v849_v18, 0 }
 0x2b8   :  { %3280 = vmatmul.mubr.msk.bf16.vlgmr.msra.gmra.mrb[16].mxu1 %vm354_vm8, %v3832_v60  ;;  %3286 = vmatmul.mubr.msk.bf16.vlgmr.msra.gmra.mrb[12].mxu0 %vm354_vm8, %v3830_v59 }
 0x2b9   :  { %3290 = vmatpush3.bf16.xpose.msra.mxu1 %v653_v13  ;;  %3296 = vmatpush3.bf16.xpose.msra.mxu0 %v702_v15 }
 0x2ba   :  { %3291 = vmatprep.mubr.msk.bf16.mxu1 %vm3704_vm1, %v3703_v3  ;;  %3297 = vmatprep.mubr.msk.bf16.mxu0 %vm3704_vm1, %v3703_v3 }
 0x2bb   :  { %3301 = vmatprep.subr.bf16.mxu1 %v3703_v3  ;;  %3307 = vmatprep.subr.bf16.mxu0 %v3703_v3 }
 0x2c0   :  { %3292 = vmatmul.mubr.msk.bf16.vlgmr.msra.gmra.mrb[20].mxu1 %vm354_vm8, %v3840_v0  ;;  %3298 = vmatmul.mubr.msk.bf16.vlgmr.msra.gmra.mrb[16].mxu0 %vm354_vm8, %v3843_v1 }
 0x2c1   :  { %3302 = vmatpush3.bf16.msra.mxu1 %v855_v20  ;;  %3308 = vmatpush3.bf16.msra.mxu0 %v903_v19 }
 0x2c2   :  { %3303 = vmatprep.mubr.msk.bf16.mxu1 %vm3704_vm1, %v3703_v3  ;;  %3309 = vmatprep.mubr.msk.bf16.mxu0 %vm3704_vm1, %v3703_v3 }
 0x2c3   :  { %3313 = vmatprep.subr.bf16.mxu1 %v3703_v3  ;;  %3319 = vmatprep.subr.bf16.mxu0 %v3703_v3 }
 0x310   :  { %v395_v21 = vpop.f32.mrb[8].mxu1 }
 0x311   :  { %v744_v22 = vmul.f32 0.35355338, %v395_v21  ;;  %v3257_v23 = vpop.f32.mrb[9].mxu1 }
 0x312   :  { %v398_v24 = vpop.f32.mrb[10].mxu1 }
 0x313   :  { %v3258_v25 = vpop.f32.mrb[11].mxu1  ;;  %v752_v26 = vsel %vm354_vm8, %v744_v22, -inf }
 0x314   :  { %753 = vmax.xlane.f32.xlu1 %v752_v26  ;;  %v444_v27 = vpop.f32.mrb[4].mxu0 }
 0x315   :  { %v745_v28 = vmul.f32 0.35355338, %v444_v27  ;;  %v3263_v30 = vpop.f32.mrb[5].mxu0 }
 0x316   :  { %v447_v31 = vpop.f32.mrb[6].mxu0 }
 0x317   :  { %v3264_v32 = vpop.f32.mrb[7].mxu0  ;;  %v755_v33 = vsel %vm354_vm8, %v745_v28, -inf }
 0x318   :  { %756 = vmax.xlane.f32.xlu0 %v755_v33 }
 0x383   :  { %v493_v34 = vpop.f32.mrb[12].mxu1  ;;  %v542_v35 = vpop.f32.mrb[8].mxu0 }
 0x384   :  { %v746_v36 = vmul.f32 0.35355338, %v493_v34  ;;  %v747_v39 = vmul.f32 0.35355338, %v542_v35  ;;  %v3269_v40 = vpop.f32.mrb[13].mxu1  ;;  %v3275_v41 = vpop.f32.mrb[9].mxu0 }
 0x385   :  { %v496_v42 = vpop.f32.mrb[14].mxu1  ;;  %v545_v43 = vpop.f32.mrb[10].mxu0 }
 0x386   :  { %v3270_v44 = vpop.f32.mrb[15].mxu1  ;;  %v3276_v45 = vpop.f32.mrb[11].mxu0  ;;  %v758_v46 = vsel %vm354_vm8, %v746_v36, -inf  ;;  %v761_v47 = vsel %vm354_vm8, %v747_v39, -inf }
 0x387   :  { %759 = vmax.xlane.f32.xlu0 %v758_v46  ;;  %762 = vmax.xlane.f32.xlu1 %v761_v47 }
 0x38b   :  { %v591_v48 = vpop.f32.mrb[16].mxu1  ;;  %v640_v49 = vpop.f32.mrb[12].mxu0 }
 0x38c   :  { %v3901_v50 = vmul.f32 0.35355338, %v591_v48  ;;  %v749_v53 = vmul.f32 0.35355338, %v640_v49  ;;  %v3281_v54 = vpop.f32.mrb[17].mxu1  ;;  %v3287_v55 = vpop.f32.mrb[13].mxu0 }
 0x38d   :  { %v594_v56 = vpop.f32.mrb[18].mxu1  ;;  %v643_v57 = vpop.f32.mrb[14].mxu0 }
 0x38e   :  { %v3282_v58 = vpop.f32.mrb[19].mxu1  ;;  %v3288_v61 = vpop.f32.mrb[15].mxu0  ;;  %v764_v62 = vsel %vm354_vm8, %v3901_v50, -inf  ;;  %v767_v63 = vsel %vm354_vm8, %v749_v53, -inf }
 0x38f   :  { %765 = vmax.xlane.f32.xlu0 %v764_v62  ;;  %768 = vmax.xlane.f32.xlu1 %v767_v63 }
 0x393   :  { %v689_v2 = vpop.f32.mrb[20].mxu1  ;;  %v738_v4 = vpop.f32.mrb[16].mxu0 }
 0x394   :  { %v3906_v5 = vmul.f32 0.35355338, %v689_v2  ;;  %v751_v6 = vmul.f32 0.35355338, %v738_v4  ;;  %v3293_v7 = vpop.f32.mrb[21].mxu1  ;;  %v3299_v8 = vpop.f32.mrb[17].mxu0 }
 0x395   :  { %v692_v9 = vpop.f32.mrb[22].mxu1  ;;  %v741_v10 = vpop.f32.mrb[18].mxu0 }
 0x396   :  { %v3294_v11 = vpop.f32.mrb[23].mxu1  ;;  %v3300_v12 = vpop.f32.mrb[19].mxu0  ;;  %v770_v13 = vsel %vm354_vm8, %v3906_v5, -inf  ;;  %v773_v15 = vsel %vm354_vm8, %v751_v6, -inf }
 0x397   :  { %771 = vmax.xlane.f32.xlu0 %v770_v13  ;;  %774 = vmax.xlane.f32.xlu1 %v773_v15 }
 0x3a1   :  { %v754_v16 = vpop.xlane.xlu1 %753 }
 0x3a2   :  { %v776_v19 = vsub.f32 %v744_v22, %v754_v16 }
 0x3a4   :  { %v784_v21 = vmul.f32 1.442695, %v776_v19 }
 0x3a5   :  { %v757_v18 = vpop.xlane.xlu0 %756 }
 0x3a6   :  { %v777_v20 = vsub.f32 %v745_v28, %v757_v18  ;;  %3583 = vpow2.f32 %v784_v21 }
 0x3a8   :  { %945 = vrot.lane.b32.xlu1 %v3823_v52, %s3710_s21  ;;  %v786_v23 = vmul.f32 1.442695, %v777_v20 }
 0x3aa   :  { %3585 = vpow2.f32 %v786_v23 }
 0x3ad   :  { %993 = vrot.lane.b32.xlu0 %v3821_v51, %s3710_s21 }
 0x3b0   :  { %v3584_v24 = vpop.eup %3583 }
 0x3b1   :  { %v800_v26 = vsel %vm354_vm8, %v3584_v24, 0.0 }
 0x3b4   :  { %v3586_v25 = vpop.eup %3585 }
 0x3b5   :  { %v803_v27 = vsel %vm354_vm8, %v3586_v25, 0.0 }
 0x3cc   :  { %801 = vadd.xlane.f32.xlu0 %v800_v26  ;;  %804 = vadd.xlane.f32.xlu1 %v803_v27 }
 0x3dd   :  { %1041 = vrot.lane.b32.xlu1 %v3832_v60, %s3710_s21 }
 0x414   :  { %v760_v51 = vpop.xlane.xlu0 %759  ;;  %v763_v52 = vpop.xlane.xlu1 %762 }
 0x415   :  { %v778_v30 = vsub.f32 %v746_v36, %v760_v51  ;;  %v779_v22 = vsub.f32 %v747_v39, %v763_v52 }
 0x417   :  { %v788_v28 = vmul.f32 1.442695, %v778_v30  ;;  %v790_v31 = vmul.f32 1.442695, %v779_v22 }
 0x419   :  { %3587 = vpow2.f32 %v788_v28  ;;  %v255_v28 = vld [vmem:[%s4459_s4] sm:$0xff] }
 0x41a   :  { %3589 = vpow2.f32 %v790_v31 }
 0x41c   :  { %v769_v32 = vpop.xlane.xlu1 %768  ;;  %v766_v47 = vpop.xlane.xlu0 %765 }
 0x41d   :  { %v781_v33 = vsub.f32 %v749_v53, %v769_v32  ;;  %v780_v48 = vsub.f32 %v3901_v50, %v766_v47  ;;  %v1234_v32 = vpack.c.bf16 %v255_v28, %v255_v28 }
 0x41f   :  { %v794_v34 = vmul.f32 1.442695, %v781_v33  ;;  %v792_v53 = vmul.f32 1.442695, %v780_v48 }
 0x421   :  { %3591 = vpow2.f32 %v794_v34 }
 0x423   :  { %v3919_v35 = vpop.eup %3587 }
 0x424   :  { %v3921_v40 = vpop.eup %3589  ;;  %v775_v41 = vpop.xlane.xlu1 %774  ;;  %v806_v60 = vsel %vm354_vm8, %v3919_v35, 0.0 }
 0x425   :  { %v783_v42 = vsub.f32 %v751_v6, %v775_v41  ;;  %807 = vadd.xlane.f32.xlu0 %v806_v60  ;;  %v809_v36 = vsel %vm354_vm8, %v3921_v40, 0.0  ;;  %v772_v49 = vpop.xlane.xlu0 %771  ;;  %v1288_v41 = vsel %vm853_vm9, %v1234_v32, 0 }
 0x426   :  { %810 = vadd.xlane.f32.xlu1 %v809_v36  ;;  %v782_v54 = vsub.f32 %v3906_v5, %v772_v49 }
 0x427   :  { %v798_v39 = vmul.f32 1.442695, %v783_v42 }
 0x428   :  { %v796_v55 = vmul.f32 1.442695, %v782_v54  ;;  %v946_v57 = vpop.permute.xlu1 %945 }
 0x429   :  { %3593 = vpow2.f32 %v798_v39  ;;  %v994_v56 = vpop.permute.xlu0 %993  ;;  %v951_v8 = vsel %vm853_vm9, %v946_v57, 0 }
 0x42a   :  { %3595 = vpow2.f32 %v792_v53  ;;  %v999_v9 = vsel %vm853_vm9, %v994_v56, 0 }
 0x42b   :  { %v3927_v43 = vpop.eup %3591  ;;  %3597 = vpow2.f32 %v796_v55 }
 0x42c   :  { %v815_v44 = vsel %vm354_vm8, %v3927_v43, 0.0 }
 0x42d   :  { %816 = vadd.xlane.f32.xlu1 %v815_v44 }
 0x433   :  { %v3931_v45 = vpop.eup %3593 }
 0x434   :  { %v821_v46 = vsel %vm354_vm8, %v3931_v45, 0.0  ;;  %v3941_v58 = vpop.eup %3595 }
 0x435   :  { %822 = vadd.xlane.f32.xlu1 %v821_v46  ;;  %v3945_v50 = vpop.eup %3597  ;;  %v256_v46 = vld [vmem:[%s4459_s4 + $0x8] sm:$0xff] }
 0x436   :  { %v1236_v47 = vpack.c.bf16 %v256_v46, %v256_v46 }
 0x438   :  { %v1241_v48 = vsel %vm853_vm9, %v1236_v47, 0  ;;  %v268_v47 = vld [vmem:[%s4461_s6 + $0x18] sm:$0xff] }
 0x43b   :  { %1089 = vrot.lane.b32.xlu0 %v3830_v59, %s3710_s21  ;;  %v812_v59 = vsel %vm354_vm8, %v3941_v58, 0.0 }
 0x446   :  { %1137 = vrot.lane.b32.xlu1 %v3840_v0, %s3710_s21  ;;  %v818_v0 = vsel %vm354_vm8, %v3945_v50, 0.0 }
 0x459   :  { %v802_v61 = vpop.xlane.xlu0 %801  ;;  %v805_v62 = vpop.xlane.xlu1 %804 }
 0x45a   :  { %3599 = vrcp.f32 %v802_v61  ;;  %813 = vadd.xlane.f32.xlu0 %v812_v59  ;;  %v258_v59 = vld [vmem:[%s4459_s4 + $0x18] sm:$0xff] }
 0x45b   :  { %3601 = vrcp.f32 %v805_v62 }
 0x45d   :  { %v1042_v10 = vpop.permute.xlu1 %1041 }
 0x45e   :  { %819 = vadd.xlane.f32.xlu0 %v818_v0 }
 0x464   :  { %v3600_v63 = vpop.eup %3599 }
 0x465   :  { %v3602_v2 = vpop.eup %3601  ;;  %v832_v4 = vmul.f32 %v3600_v63, %v3584_v24  ;;  %v1047_v24 = vsel %vm853_vm9, %v1042_v10, 0  ;;  %v257_v63 = vld [vmem:[%s4459_s4 + $0x10] sm:$0xff] }
 0x466   :  { %v833_v5 = vmul.f32 %v3602_v2, %v3586_v25  ;;  %v1332_v2 = vpack.c.bf16 %v257_v63, %v257_v63 }
 0x467   :  { %v840_v6 = vpack.c.bf16 %v832_v4, %v832_v4 }
 0x468   :  { %v841_v7 = vpack.c.bf16 %v833_v5, %v833_v5  ;;  %v1337_v10 = vsel %vm853_vm9, %v1332_v2, 0 }
 0x469   :  { %3304 = vmatmul.mubr.msk.bf16.vlgmr.msra.gmra.mrb[24].mxu1 %vm354_vm8, %v840_v6 }
 0x46a   :  { %3310 = vmatmul.mubr.msk.bf16.vlgmr.msra.gmra.mrb[20].mxu0 %vm354_vm8, %v841_v7  ;;  %3314 = vmatpush3.bf16.msra.mxu1 %v951_v8 }
 0x46b   :  { %3320 = vmatpush3.bf16.msra.mxu0 %v999_v9  ;;  %3315 = vmatprep.mubr.msk.bf16.mxu1 %vm3704_vm1, %v3703_v3 }
 0x46c   :  { %3321 = vmatprep.mubr.msk.bf16.mxu0 %vm3704_vm1, %v3703_v3  ;;  %3325 = vmatprep.subr.bf16.mxu1 %v3703_v3 }
 0x46d   :  { %3331 = vmatprep.subr.bf16.mxu0 %v3703_v3 }
 0x474   :  { %1185 = vrot.lane.b32.xlu0 %v3843_v1, %s3710_s21 }
 0x4b2   :  { %v808_v11 = vpop.xlane.xlu0 %807 }
 0x4b3   :  { %3603 = vrcp.f32 %v808_v11  ;;  %v811_v12 = vpop.xlane.xlu1 %810 }
 0x4b4   :  { %3605 = vrcp.f32 %v811_v12 }
 0x4b6   :  { %v1090_v20 = vpop.permute.xlu0 %1089 }
 0x4b7   :  { %v1095_v1 = vsel %vm853_vm9, %v1090_v20, 0 }
 0x4ba   :  { %v817_v13 = vpop.xlane.xlu1 %816 }
 0x4bb   :  { %3607 = vrcp.f32 %v817_v13 }
 0x4bd   :  { %v3604_v15 = vpop.eup %3603 }
 0x4be   :  { %v3606_v16 = vpop.eup %3605  ;;  %v834_v18 = vmul.f32 %v3604_v15, %v3919_v35 }
 0x4bf   :  { %v835_v19 = vmul.f32 %v3606_v16, %v3921_v40 }
 0x4c0   :  { %v842_v21 = vpack.c.bf16 %v834_v18, %v834_v18 }
 0x4c1   :  { %v843_v23 = vpack.c.bf16 %v835_v19, %v835_v19 }
 0x4c2   :  { %3316 = vmatmul.mubr.msk.bf16.vlgmr.msra.gmra.mrb[28].mxu1 %vm354_vm8, %v842_v21  ;;  %v823_v51 = vpop.xlane.xlu1 %822 }
 0x4c3   :  { %3322 = vmatmul.mubr.msk.bf16.vlgmr.msra.gmra.mrb[24].mxu0 %vm354_vm8, %v843_v23  ;;  %3326 = vmatpush3.bf16.msra.mxu1 %v1047_v24  ;;  %3609 = vrcp.f32 %v823_v51 }
 0x4c4   :  { %3332 = vmatpush3.bf16.msra.mxu0 %v1095_v1  ;;  %3333 = vmatprep.mubr.msk.bf16.mxu0 %vm3704_vm1, %v3703_v3 }
 0x4c5   :  { %3343 = vmatprep.subr.bf16.mxu0 %v3703_v3  ;;  %3327 = vmatprep.mubr.msk.bf16.mxu1 %vm3704_vm1, %v3703_v3  ;;  %v3608_v25 = vpop.eup %3607 }
 0x4c6   :  { %3337 = vmatprep.subr.bf16.mxu1 %v3703_v3  ;;  %v837_v26 = vmul.f32 %v3608_v25, %v3927_v43  ;;  %v1138_v42 = vpop.permute.xlu1 %1137 }
 0x4c7   :  { %v1143_v43 = vsel %vm853_vm9, %v1138_v42, 0  ;;  %v261_v42 = vld [vmem:[%s4460_s5 + $0x10] sm:$0xff] }
 0x4c8   :  { %v845_v27 = vpack.c.bf16 %v837_v26, %v837_v26 }
 0x4cb   :  { %3334 = vmatmul.mubr.msk.bf16.vlgmr.msra.gmra.mrb[28].mxu0 %vm354_vm8, %v845_v27 }
 0x4cc   :  { %3345 = vmatprep.mubr.msk.bf16.mxu0 %vm3704_vm1, %v3703_v3 }
 0x4cd   :  { %v3610_v30 = vpop.eup %3609 }
 0x4ce   :  { %v839_v31 = vmul.f32 %v3610_v30, %v3931_v45 }
 0x4d0   :  { %v847_v40 = vpack.c.bf16 %v839_v31, %v839_v31 }
 0x4e7   :  { %v814_v52 = vpop.xlane.xlu0 %813 }
 0x4e8   :  { %3611 = vrcp.f32 %v814_v52 }
 0x4eb   :  { %v820_v22 = vpop.xlane.xlu0 %819 }
 0x4ec   :  { %3613 = vrcp.f32 %v820_v22 }
 0x4ef   :  { %v1186_v33 = vpop.permute.xlu0 %1185 }
 0x4f0   :  { %v1191_v34 = vsel %vm853_vm9, %v1186_v33, 0 }
 0x4f1   :  { %3344 = vmatpush3.bf16.msra.mxu0 %v1191_v34 }
 0x4f2   :  { %v3612_v35 = vpop.eup %3611  ;;  %3355 = vmatprep.subr.bf16.mxu0 %v3703_v3 }
 0x4f3   :  { %v836_v60 = vmul.f32 %v3612_v35, %v3941_v58 }
 0x4f4   :  { %3346 = vmatmul.mubr.msk.bf16.vlgmr.msra.gmra.mrb[32].mxu0 %vm354_vm8, %v847_v40  ;;  %v259_v40 = vld [vmem:[%s4460_s5] sm:$0xff] }
 0x4f5   :  { %v844_v36 = vpack.c.bf16 %v836_v60, %v836_v60  ;;  %3356 = vmatpush3.bf16.msra.mxu0 %v1288_v41  ;;  %3357 = vmatprep.mubr.msk.bf16.mxu0 %vm3704_vm1, %v3703_v3  ;;  %v260_v41 = vld [vmem:[%s4460_s5 + $0x8] sm:$0xff] }
 0x4f6   :  { %v3614_v39 = vpop.eup %3613  ;;  %3367 = vmatprep.subr.bf16.mxu0 %v3703_v3  ;;  %v263_v60 = vpack.c.bf16 %v260_v41, %v259_v40  ;;  %v4062_v40 = vld [vmem:[%s4457_s2] sm:$0x3f]  ;;  %v1474_v41 = vsub.s32 1, %v3793_v14 }
 0x4f7   :  { %3328 = vmatmul.mubr.msk.bf16.vlgmr.msra.gmra.mrb[32].mxu1 %vm354_vm8, %v844_v36  ;;  %v838_v44 = vmul.f32 %v3614_v39, %v3945_v50  ;;  %v1383_v50 = vpack.c.bf16 %v258_v59, %v258_v59  ;;  %v262_v36 = vld [vmem:[%s4460_s5 + $0x18] sm:$0xff] }
 0x4f8   :  { %3338 = vmatpush3.bf16.msra.mxu1 %v1143_v43  ;;  %3339 = vmatprep.mubr.msk.bf16.mxu1 %vm3704_vm1, %v3703_v3  ;;  %v264_v39 = vpack.c.bf16 %v262_v36, %v261_v42  ;;  %v265_v43 = vld [vmem:[%s4461_s6] sm:$0xff] }
 0x4f9   :  { %3349 = vmatprep.subr.bf16.mxu1 %v3703_v3  ;;  %v846_v45 = vpack.c.bf16 %v838_v44, %v838_v44  ;;  %v1388_v0 = vsel %vm853_vm9, %v1383_v50, 0  ;;  %v266_v44 = vld [vmem:[%s4461_s6 + $0x8] sm:$0xff] }
 0x4fa   :  { %v273_v46 = vpack.c.bf16 %v266_v44, %v265_v43  ;;  %v1475_v43 = vrot.slane %v4062_v40, %v1474_v41 }
 0x4ff   :  { %3340 = vmatmul.mubr.msk.bf16.vlgmr.msra.gmra.mrb[36].mxu1 %vm354_vm8, %v846_v45  ;;  %v267_v45 = vld [vmem:[%s4461_s6 + $0x10] sm:$0xff] }
 0x500   :  { %3351 = vmatprep.mubr.msk.bf16.mxu1 %vm3704_vm1, %v3703_v3  ;;  %3350 = vmatpush3.bf16.msra.mxu1 %v1241_v48  ;;  %v274_v48 = vpack.c.bf16 %v268_v47, %v267_v45 }
 0x501   :  { %3361 = vmatprep.subr.bf16.mxu1 %v3703_v3 }
 0x53c   :  { %v891_v49 = vpop.f32.mrb[24].mxu1 }
 0x53d   :  { %v939_v53 = vpop.f32.mrb[20].mxu0  ;;  %v3305_v54 = vpop.f32.mrb[25].mxu1 }
 0x53e   :  { %v1233_v55 = vpack.c.bf16 %v939_v53, %v891_v49  ;;  %v3311_v56 = vpop.f32.mrb[21].mxu0  ;;  %v894_v57 = vpop.f32.mrb[26].mxu1 }
 0x53f   :  { %v942_v58 = vpop.f32.mrb[22].mxu0  ;;  %v3306_v61 = vpop.f32.mrb[27].mxu1 }
 0x540   :  { %v3312_v62 = vpop.f32.mrb[23].mxu0  ;;  %3358 = vmatmul.mubr.msk.bf16.vlgmr.msra.gmra.mrb[36].mxu0 %vm354_vm8, %v1233_v55 }
 0x541   :  { %3369 = vmatprep.mubr.msk.bf16.mxu0 %vm3704_vm1, %v3703_v3  ;;  %3368 = vmatpush3.bf16.msra.mxu0 %v1388_v0 }
 0x542   :  { %3381 = vmatprep.subr.bf16.mxu0 %v3703_v3 }
 0x595   :  { %v987_v4 = vpop.f32.mrb[28].mxu1 }
 0x596   :  { %v1035_v5 = vpop.f32.mrb[24].mxu0  ;;  %v3317_v6 = vpop.f32.mrb[29].mxu1 }
 0x597   :  { %v1235_v7 = vpack.c.bf16 %v1035_v5, %v987_v4  ;;  %v3323_v8 = vpop.f32.mrb[25].mxu0  ;;  %v990_v9 = vpop.f32.mrb[30].mxu1 }
 0x598   :  { %v1038_v11 = vpop.f32.mrb[26].mxu0  ;;  %v3318_v12 = vpop.f32.mrb[31].mxu1 }
 0x599   :  { %v3324_v13 = vpop.f32.mrb[27].mxu0  ;;  %3352 = vmatmul.mubr.msk.bf16.vlgmr.msra.gmra.mrb[40].mxu1 %vm354_vm8, %v1235_v7 }
 0x59a   :  { %3362 = vmatpush3.bf16.msra.mxu1 %v1337_v10  ;;  %3363 = vmatprep.mubr.msk.bf16.mxu1 %vm3704_vm1, %v3703_v3 }
 0x59b   :  { %3373 = vmatprep.subr.bf16.mxu1 %v3703_v3 }
 0x59e   :  { %v1131_v15 = vpop.f32.mrb[28].mxu0 }
 0x59f   :  { %v3335_v16 = vpop.f32.mrb[29].mxu0 }
 0x5a0   :  { %v1134_v18 = vpop.f32.mrb[30].mxu0 }
 0x5a1   :  { %v3336_v19 = vpop.f32.mrb[31].mxu0 }
 0x5c7   :  { %v1227_v20 = vpop.f32.mrb[32].mxu0 }
 0x5c8   :  { %v3347_v21 = vpop.f32.mrb[33].mxu0 }
 0x5c9   :  { %v1230_v23 = vpop.f32.mrb[34].mxu0 }
 0x5ca   :  { %v1083_v24 = vpop.f32.mrb[32].mxu1  ;;  %v3348_v1 = vpop.f32.mrb[35].mxu0 }
 0x5cb   :  { %v1331_v25 = vpack.c.bf16 %v1131_v15, %v1083_v24  ;;  %v3329_v26 = vpop.f32.mrb[33].mxu1 }
 0x5cc   :  { %v1086_v27 = vpop.f32.mrb[34].mxu1 }
 0x5cd   :  { %v3330_v51 = vpop.f32.mrb[35].mxu1  ;;  %3364 = vmatmul.mubr.msk.bf16.vlgmr.msra.gmra.mrb[44].mxu1 %vm354_vm8, %v1331_v25 }
 0x5ce   :  { %3377 = vmatprep.mubr.msk.bf16.mxu1 %vm3704_vm1, %v3703_v3  ;;  %3374 = vmatpush3.bf16.msra.mxu1 %v263_v60  ;;  %v1469_v60 = vrot.slane %v4062_v40, %v3802_v29 }
 0x5cf   :  { %3375 = vmatprep.subr.bf16.mxu1 %v3703_v3 }
 0x5d2   :  { %v1179_v52 = vpop.f32.mrb[36].mxu1  ;;  %3376 = vmatpush3.bf16.msra.mxu1 %v264_v39 }
 0x5d3   :  { %v1382_v30 = vpack.c.bf16 %v1227_v20, %v1179_v52  ;;  %v3341_v22 = vpop.f32.mrb[37].mxu1  ;;  %3393 = vmatprep.subr.bf16.mxu1 %v3703_v3 }
 0x5d4   :  { %v1182_v28 = vpop.f32.mrb[38].mxu1 }
 0x5d5   :  { %v3342_v31 = vpop.f32.mrb[39].mxu1  ;;  %3370 = vmatmul.mubr.msk.bf16.vlgmr.msra.gmra.mrb[40].mxu0 %vm354_vm8, %v1382_v30 }
 0x5d6   :  { %3389 = vmatprep.mubr.msk.bf16.mxu0 %vm3704_vm1, %v3703_v3  ;;  %3382 = vmatpush3.bf16.msra.mxu0 %v273_v46 }
 0x5d7   :  { %3383 = vmatprep.subr.bf16.mxu0 %v3703_v3 }
 0x5da   :  { %3384 = vmatpush3.bf16.msra.mxu0 %v274_v48 }
 0x5db   :  { %3385 = vmatprep.subr.bf16.mxu0 %v3703_v3 }
 0x613   :  { %v1324_v32 = vpop.f32.mrb[36].mxu0 }
 0x614   :  { %v3359_v33 = vpop.f32.mrb[37].mxu0 }
 0x615   :  { %v1327_v34 = vpop.f32.mrb[38].mxu0 }
 0x616   :  { %v3360_v35 = vpop.f32.mrb[39].mxu0 }
 0x66c   :  { %v1277_v49 = vpop.f32.mrb[40].mxu1 }
 0x66d   :  { %v1325_v53 = vadd.f32 %v1324_v32, %v1277_v49  ;;  %v3353_v54 = vpop.f32.mrb[41].mxu1  ;;  %v269_v49 = vld [vmem:[%s4461_s6 + $0x20] sm:$0xff] }
 0x66e   :  { %v1280_v55 = vpop.f32.mrb[42].mxu1 }
 0x66f   :  { %v1328_v56 = vadd.f32 %v1327_v34, %v1280_v55  ;;  %v3354_v57 = vpop.f32.mrb[43].mxu1  ;;  %v271_v55 = vld [vmem:[%s4461_s6 + $0x30] sm:$0xff] }
 0x6a0   :  { %v1373_v58 = vpop.f32.mrb[44].mxu1 }
 0x6a1   :  { %v1380_v61 = vadd.f32 %v1373_v58, %v1325_v53  ;;  %v3365_v62 = vpop.f32.mrb[45].mxu1  ;;  %v270_v53 = vld [vmem:[%s4461_s6 + $0x28] sm:$0xff]  ;;  %v1482_v58 = vrot.slane %v4062_v40, %v3796_v17 }
 0x6a2   :  { %v1376_v59 = vpop.f32.mrb[46].mxu1  ;;  %v275_v54 = vpack.c.bf16 %v270_v53, %v269_v49 }
 0x6a3   :  { %v1381_v50 = vadd.f32 %v1376_v59, %v1328_v56  ;;  %v3366_v0 = vpop.f32.mrb[47].mxu1  ;;  %v272_v56 = vld [vmem:[%s4461_s6 + $0x38] sm:$0xff] }
 0x6a4   :  { %3386 = vmatpush3.bf16.msra.mxu0 %v275_v54  ;;  %v276_v57 = vpack.c.bf16 %v272_v56, %v271_v55  ;;  %v1614_v54 = vsub.s32 2, %v3793_v14  ;;  %v1620_v55 = vsub.s32 3, %v3793_v14 }
 0x6a5   :  { %3387 = vmatprep.subr.bf16.mxu0 %v3703_v3 }
 0x6a6   :  { %v1615_v56 = vrot.slane %v4062_v40, %v1614_v54 }
 0x6a8   :  { %v1424_v63 = vpop.f32.mrb[40].mxu0  ;;  %3388 = vmatpush3.bf16.msra.mxu0 %v276_v57 }
 0x6a9   :  { %v1431_v2 = vadd.f32 %v1424_v63, %v1380_v61  ;;  %v3371_v4 = vpop.f32.mrb[41].mxu0  ;;  %3407 = vmatprep.subr.bf16.mxu0 %v3703_v3 }
 0x6aa   :  { %v1427_v5 = vpop.f32.mrb[42].mxu0 }
 0x6ab   :  { %v1433_v6 = vadd.f32 %v1431_v2, %v3807_v37  ;;  %v1432_v7 = vadd.f32 %v1427_v5, %v1381_v50  ;;  %v3372_v8 = vpop.f32.mrb[43].mxu0 }
 0x6ad   :  { %v1444_v9 = vmul.f32 %v1433_v6, %v1433_v6  ;;  %v1434_v10 = vadd.f32 %v1432_v7, %v3809_v38  ;;  %v1435_v11 = vsel %vm278_vm7, %v1433_v6, 0.0  ;;  %v3086_v7 = vld [vmem:[%s4458_s3 + $0x28] sm:$0xff] }
 0x6af   :  { %v1436_v12 = vsel %vm278_vm7, %v1434_v10, 0.0  ;;  %v1445_v13 = vmul.f32 %v1434_v10, %v1434_v10  ;;  %v1446_v16 = vsel %vm278_vm7, %v1444_v9, 0.0  ;;  %v3087_v9 = vld [vmem:[%s4458_s3 + $0x30] sm:$0xff] }
 0x6b0   :  { %v1437_v15 = vadd.f32 %v1436_v12, %v1435_v11  ;;  %v1532_v12 = vsub.s32 4, %v3793_v14 }
 0x6b1   :  { %v1447_v18 = vsel %vm278_vm7, %v1445_v13, 0.0 }
 0x6b2   :  { %v1438_v19 = vrot.slane %v1437_v15, 4  ;;  %v1448_v20 = vadd.f32 %v1447_v18, %v1446_v16  ;;  %v1533_v13 = vrot.slane %v4062_v40, %v1532_v12 }
 0x6b4   :  { %v1439_v21 = vadd.f32 %v1438_v19, %v1437_v15  ;;  %v1449_v23 = vrot.slane %v1448_v20, 4 }
 0x6b6   :  { %v1440_v37 = vrot.slane %v1439_v21, 2  ;;  %v1450_v24 = vadd.f32 %v1449_v23, %v1448_v20 }
 0x6b8   :  { %v1441_v1 = vadd.f32 %v1440_v37, %v1439_v21  ;;  %v1451_v25 = vrot.slane %v1450_v24, 2 }
 0x6ba   :  { %v1442_v26 = vrot.slane %v1441_v1, 1  ;;  %v1452_v38 = vadd.f32 %v1451_v25, %v1450_v24 }
 0x6bc   :  { %v1443_v27 = vadd.f32 %v1442_v26, %v1441_v1  ;;  %v1453_v51 = vrot.slane %v1452_v38, 1 }
 0x6be   :  { %v1454_v52 = vadd.f32 %v1453_v51, %v1452_v38  ;;  %v1455_v30 = vmul.f32 0.0625, %v1443_v27 }
 0x6c0   :  { %v1456_v22 = vmul.f32 0.0625, %v1454_v52  ;;  %v1457_v28 = vmul.f32 %v1455_v30, %v1455_v30  ;;  %v1462_v31 = vsub.f32 %v1433_v6, %v1455_v30  ;;  %v1463_v32 = vsub.f32 %v1434_v10, %v1455_v30  ;;  %v3085_v6 = vld [vmem:[%s4458_s3 + $0x20] sm:$0xff]  ;;  %v3088_v10 = vld [vmem:[%s4458_s3 + $0x38] sm:$0xff] }
 0x6c1   :  { %v1631_v8 = vpack.c.bf16 %v3086_v7, %v3085_v6  ;;  %v1632_v11 = vpack.c.bf16 %v3088_v10, %v3087_v9 }
 0x6c2   :  { %v1458_v33 = vsub.f32 %v1456_v22, %v1457_v28 }
 0x6c4   :  { %v1459_v34 = vmax.f32 %v1458_v33, 0.0 }
 0x6c6   :  { %v1460_v35 = vadd.f32 1e-05, %v1459_v34 }
 0x6c8   :  { %3615 = vrsqrt.f32 %v1460_v35 }
 0x6d2   :  { %v3616_v42 = vpop.eup %3615 }
 0x6d3   :  { %v1464_v36 = vmul.f32 %v3616_v42, %v1462_v31  ;;  %v1465_v39 = vmul.f32 %v3616_v42, %v1463_v32 }
 0x6d5   :  { %v1470_v44 = vmul.f32 %v1469_v60, %v1464_v36  ;;  %v1471_v45 = vmul.f32 %v1469_v60, %v1465_v39 }
 0x6d7   :  { %v1477_v46 = vadd.f32 %v1475_v43, %v1471_v45  ;;  %v1476_v47 = vadd.f32 %v1475_v43, %v1470_v44 }
 0x6d9   :  { %v1478_v48 = vpack.c.bf16 %v1477_v46, %v1476_v47 }
 0x6db   :  { %3378 = vmatmul.mubr.msk.bf16.vlgmr.msra.gmra.mrb[48].mxu1 %vm278_vm7, %v1478_v48 }
 0x6dc   :  { %3397 = vmatprep.mubr.msk.bf16.mxu1 %vm3704_vm1, %v3703_v3  ;;  %3394 = vmatpush3.bf16.msra.mxu1 %v1631_v8 }
 0x6dd   :  { %3395 = vmatprep.subr.bf16.mxu1 %v3703_v3 }
 0x6e0   :  { %3396 = vmatpush3.bf16.msra.mxu1 %v1632_v11 }
 0x6e1   :  { %3401 = vmatprep.subr.bf16.mxu1 %v3703_v3 }
 0x7ae   :  { %v1520_v61 = vpop.f32.mrb[48].mxu1 }
 0x7af   :  { %v1521_v62 = vadd.f32 %v1520_v61, %v1482_v58  ;;  %v3379_v59 = vpop.f32.mrb[49].mxu1 }
 0x7b0   :  { %v1523_v50 = vpop.f32.mrb[50].mxu1 }
 0x7b1   :  { %v1524_v0 = vadd.f32 %v1523_v50, %v1482_v58  ;;  %v3380_v63 = vpop.f32.mrb[51].mxu1  ;;  %v1527_v2 = vmax.f32 %v1521_v62, 0.0  ;;  %v1621_v62 = vrot.slane %v4062_v40, %v1620_v55 }
 0x7b3   :  { %v1528_v4 = vmax.f32 %v1524_v0, 0.0 }
 0x7b5   :  { %v1529_v5 = vpack.c.bf16 %v1528_v4, %v1527_v2 }
 0x7b7   :  { %3390 = vmatmul.mubr.msk.bf16.vlgmr.msra.gmra.mrb[44].mxu0 %vm1534_vm10, %v1529_v5 }
 0x7b8   :  { %3409 = vmatprep.mubr.msk.bf16.mxu0 %vm3704_vm1, %v3703_v3 }
 0x88a   :  { %v1572_v15 = vpop.f32.mrb[44].mxu0 }
 0x88b   :  { %v1573_v16 = vadd.f32 %v1572_v15, %v1533_v13  ;;  %v3391_v18 = vpop.f32.mrb[45].mxu0 }
 0x88c   :  { %v1575_v19 = vpop.f32.mrb[46].mxu0 }
 0x88d   :  { %v1579_v20 = vadd.f32 %v1573_v16, %v1476_v47  ;;  %v1576_v21 = vadd.f32 %v1575_v19, %v1533_v13  ;;  %v3392_v23 = vpop.f32.mrb[47].mxu0 }
 0x88f   :  { %v1590_v37 = vmul.f32 %v1579_v20, %v1579_v20  ;;  %v1580_v24 = vadd.f32 %v1576_v21, %v1477_v46  ;;  %v1581_v1 = vsel %vm278_vm7, %v1579_v20, 0.0 }
 0x891   :  { %v1582_v25 = vsel %vm278_vm7, %v1580_v24, 0.0  ;;  %v1591_v26 = vmul.f32 %v1580_v24, %v1580_v24  ;;  %v1592_v27 = vsel %vm278_vm7, %v1590_v37, 0.0 }
 0x892   :  { %v1583_v38 = vadd.f32 %v1582_v25, %v1581_v1 }
 0x893   :  { %v1593_v51 = vsel %vm278_vm7, %v1591_v26, 0.0 }
 0x894   :  { %v1584_v52 = vrot.slane %v1583_v38, 4  ;;  %v1594_v30 = vadd.f32 %v1593_v51, %v1592_v27 }
 0x896   :  { %v1585_v22 = vadd.f32 %v1584_v52, %v1583_v38  ;;  %v1595_v28 = vrot.slane %v1594_v30, 4 }
 0x898   :  { %v1586_v31 = vrot.slane %v1585_v22, 2  ;;  %v1596_v32 = vadd.f32 %v1595_v28, %v1594_v30 }
 0x89a   :  { %v1587_v33 = vadd.f32 %v1586_v31, %v1585_v22  ;;  %v1597_v34 = vrot.slane %v1596_v32, 2 }
 0x89c   :  { %v1588_v35 = vrot.slane %v1587_v33, 1  ;;  %v1598_v60 = vadd.f32 %v1597_v34, %v1596_v32 }
 0x89e   :  { %v1589_v42 = vadd.f32 %v1588_v35, %v1587_v33  ;;  %v1599_v36 = vrot.slane %v1598_v60, 1 }
 0x8a0   :  { %v1600_v39 = vadd.f32 %v1599_v36, %v1598_v60  ;;  %v1601_v43 = vmul.f32 0.0625, %v1589_v42 }
 0x8a2   :  { %v1602_v44 = vmul.f32 0.0625, %v1600_v39  ;;  %v1603_v45 = vmul.f32 %v1601_v43, %v1601_v43  ;;  %v1608_v46 = vsub.f32 %v1579_v20, %v1601_v43  ;;  %v1609_v47 = vsub.f32 %v1580_v24, %v1601_v43 }
 0x8a4   :  { %v1604_v48 = vsub.f32 %v1602_v44, %v1603_v45 }
 0x8a6   :  { %v1605_v49 = vmax.f32 %v1604_v48, 0.0 }
 0x8a8   :  { %v1606_v53 = vadd.f32 1e-05, %v1605_v49 }
 0x8aa   :  { %3617 = vrsqrt.f32 %v1606_v53 }
 0x8b4   :  { %v3618_v57 = vpop.eup %3617 }
 0x8b5   :  { %v1610_v58 = vmul.f32 %v3618_v57, %v1608_v46  ;;  %v1611_v61 = vmul.f32 %v3618_v57, %v1609_v47 }
 0x8b7   :  { %v1616_v59 = vmul.f32 %v1615_v56, %v1610_v58  ;;  %v1617_v50 = vmul.f32 %v1615_v56, %v1611_v61 }
 0x8b9   :  { %v4122_v0 = vadd.f32 %v1621_v62, %v1617_v50  ;;  %v4124_v63 = vadd.f32 %v1621_v62, %v1616_v59 }
 0x8bb   :  { %v1658_v2 = vpack.c.bf16 %v4122_v0, %v4124_v63 }
 0x8bd   :  { %3398 = vmatmul.mubr.msk.bf16.vlgmr.msra.gmra.mrb[52].mxu1 %vm278_vm7, %v1658_v2 }
 0x8be   :  { %3403 = vmatprep.mubr.msk.bf16.mxu1 %vm3704_vm1, %v3703_v3 }
 0x990   :  { %v1696_v4 = vpop.f32.mrb[52].mxu1 }
 0x991   :  { %v3399_v5 = vpop.f32.mrb[53].mxu1  ;;  %v1723_v40 = vpack.c.bf16 %v1696_v4, %v1696_v4 }
 0x992   :  { %v1699_v6 = vpop.f32.mrb[54].mxu1 }
 0x993   :  { %v3400_v7 = vpop.f32.mrb[55].mxu1  ;;  %v3573_v8 = vpack.i.bf16 %v1699_v6, %v1696_v4  ;;  %v4135_v9 = vpack.c.bf16 %v1699_v6, %v1699_v6 }
 0x995   :  { %3574 = vrot.lane.b32.xlu0 %v3573_v8, %s3709_s20  ;;  %3569 = vrot.lane.b32.xlu1 %v3573_v8, %s3707_s18 }
 0x999   :  { %1732 = vrot.lane.b32.xlu0 %v1723_v40, %s3708_s19  ;;  %3579 = vrot.lane.b32.xlu1 %v3573_v8, %s3706_s17 }
 0x99d   :  { %1781 = vrot.lane.b32.xlu1 %v4135_v9, %s3708_s19 }
 0xa07   :  { %v3575_v10 = vpop.permute.xlu0 %3574  ;;  %v3570_v11 = vpop.permute.xlu1 %3569 }
 0xa08   :  { %v3572_v13 = vunpack.i.h.bf16 %v3570_v11  ;;  %v3571_v15 = vunpack.i.l.bf16 %v3570_v11  ;;  %v3577_v16 = vunpack.i.h.bf16 %v3575_v10  ;;  %v3576_v18 = vunpack.i.l.bf16 %v3575_v10 }
 0xa0a   :  { %v4139_v19 = vpack.c.bf16 %v3572_v13, %v3572_v13  ;;  %v4141_v20 = vpack.c.bf16 %v3571_v15, %v3571_v15  ;;  %v4148_v24 = vpack.c.bf16 %v3577_v16, %v3577_v16  ;;  %v4150_v1 = vpack.c.bf16 %v3576_v18, %v3576_v18 }
 0xa0b   :  { %v1733_v21 = vpop.permute.xlu0 %1732  ;;  %v3580_v23 = vpop.permute.xlu1 %3579 }
 0xa0c   :  { %v1738_v37 = vsel %vm354_vm8, %v1733_v21, 0  ;;  %1830 = vrot.lane.b32.xlu0 %v4141_v20, %s3708_s19  ;;  %1879 = vrot.lane.b32.xlu1 %v4139_v19, %s3708_s19  ;;  %v3581_v25 = vunpack.i.l.bf16 %v3580_v23  ;;  %v3582_v26 = vunpack.i.h.bf16 %v3580_v23 }
 0xa0d   :  { %3402 = vmatpush3.bf16.xpose.msra.mxu1 %v1738_v37 }
 0xa0e   :  { %3413 = vmatprep.subr.bf16.mxu1 %v3703_v3  ;;  %v4158_v51 = vpack.c.bf16 %v3581_v25, %v3581_v25  ;;  %v4161_v52 = vpack.c.bf16 %v3582_v26, %v3582_v26 }
 0xa0f   :  { %v1782_v38 = vpop.permute.xlu1 %1781 }
 0xa10   :  { %v1787_v27 = vsel %vm354_vm8, %v1782_v38, 0  ;;  %1928 = vrot.lane.b32.xlu0 %v4150_v1, %s3708_s19  ;;  %1977 = vrot.lane.b32.xlu1 %v4148_v24, %s3708_s19 }
 0xa11   :  { %3408 = vmatpush3.bf16.xpose.msra.mxu0 %v1787_v27 }
 0xa12   :  { %3419 = vmatprep.subr.bf16.mxu0 %v3703_v3 }
 0xa14   :  { %3404 = vmatmul.mubr.msk.bf16.vlgmr.msra.gmra.mrb[56].mxu1 %vm354_vm8, %v1723_v40  ;;  %2026 = vrot.lane.b32.xlu0 %v4158_v51, %s3708_s19 }
 0xa15   :  { %2075 = vrot.lane.b32.xlu1 %v4161_v52, %s3708_s19  ;;  %3415 = vmatprep.mubr.msk.bf16.mxu1 %vm3704_vm1, %v3703_v3 }
 0xa18   :  { %3410 = vmatmul.mubr.msk.bf16.vlgmr.msra.gmra.mrb[48].mxu0 %vm354_vm8, %v4135_v9 }
 0xa19   :  { %2227 = vrot.lane.b32.xlu1 %v1723_v40, %s3710_s21  ;;  %3421 = vmatprep.mubr.msk.bf16.mxu0 %vm3704_vm1, %v3703_v3 }
 0xa7e   :  { %v1831_v30 = vpop.permute.xlu0 %1830  ;;  %v1880_v22 = vpop.permute.xlu1 %1879 }
 0xa7f   :  { %v1836_v28 = vsel %vm354_vm8, %v1831_v30, 0  ;;  %v1885_v31 = vsel %vm354_vm8, %v1880_v22, 0 }
 0xa80   :  { %3414 = vmatpush3.bf16.xpose.msra.mxu1 %v1836_v28  ;;  %3420 = vmatpush3.bf16.xpose.msra.mxu0 %v1885_v31 }
 0xa81   :  { %3425 = vmatprep.subr.bf16.mxu1 %v3703_v3  ;;  %3431 = vmatprep.subr.bf16.mxu0 %v3703_v3 }
 0xa82   :  { %v1929_v32 = vpop.permute.xlu0 %1928  ;;  %v1978_v33 = vpop.permute.xlu1 %1977 }
 0xa83   :  { %v1934_v34 = vsel %vm354_vm8, %v1929_v32, 0  ;;  %v1983_v35 = vsel %vm354_vm8, %v1978_v33, 0 }
 0xa86   :  { %v2027_v60 = vpop.permute.xlu0 %2026 }
 0xa87   :  { %3416 = vmatmul.mubr.msk.bf16.vlgmr.msra.gmra.mrb[60].mxu1 %vm354_vm8, %v4141_v20  ;;  %3422 = vmatmul.mubr.msk.bf16.vlgmr.msra.gmra.mrb[52].mxu0 %vm354_vm8, %v4139_v19  ;;  %v2076_v42 = vpop.permute.xlu1 %2075  ;;  %v2032_v36 = vsel %vm354_vm8, %v2027_v60, 0 }
 0xa88   :  { %3426 = vmatpush3.bf16.xpose.msra.mxu1 %v1934_v34  ;;  %3432 = vmatpush3.bf16.xpose.msra.mxu0 %v1983_v35  ;;  %v2081_v39 = vsel %vm354_vm8, %v2076_v42, 0 }
 0xa89   :  { %3427 = vmatprep.mubr.msk.bf16.mxu1 %vm3704_vm1, %v3703_v3  ;;  %3433 = vmatprep.mubr.msk.bf16.mxu0 %vm3704_vm1, %v3703_v3 }
 0xa8a   :  { %3437 = vmatprep.subr.bf16.mxu1 %v3703_v3  ;;  %3443 = vmatprep.subr.bf16.mxu0 %v3703_v3 }
 0xa8b   :  { %v2228_v43 = vpop.permute.xlu1 %2227 }
 0xa8c   :  { %v2233_v44 = vsel %vm853_vm9, %v2228_v43, 0 }
 0xa8f   :  { %3428 = vmatmul.mubr.msk.bf16.vlgmr.msra.gmra.mrb[64].mxu1 %vm354_vm8, %v4150_v1  ;;  %3434 = vmatmul.mubr.msk.bf16.vlgmr.msra.gmra.mrb[56].mxu0 %vm354_vm8, %v4148_v24 }
 0xa90   :  { %3438 = vmatpush3.bf16.xpose.msra.mxu1 %v2032_v36  ;;  %3444 = vmatpush3.bf16.xpose.msra.mxu0 %v2081_v39 }
 0xa91   :  { %3439 = vmatprep.mubr.msk.bf16.mxu1 %vm3704_vm1, %v3703_v3  ;;  %3445 = vmatprep.mubr.msk.bf16.mxu0 %vm3704_vm1, %v3703_v3 }
 0xa92   :  { %3449 = vmatprep.subr.bf16.mxu1 %v3703_v3  ;;  %3455 = vmatprep.subr.bf16.mxu0 %v3703_v3 }
 0xa97   :  { %3440 = vmatmul.mubr.msk.bf16.vlgmr.msra.gmra.mrb[68].mxu1 %vm354_vm8, %v4158_v51  ;;  %3446 = vmatmul.mubr.msk.bf16.vlgmr.msra.gmra.mrb[60].mxu0 %vm354_vm8, %v4161_v52 }
 0xa98   :  { %3450 = vmatpush3.bf16.msra.mxu1 %v2233_v44  ;;  %3457 = vmatprep.mubr.msk.bf16.mxu0 %vm3704_vm1, %v3703_v3 }
 0xa99   :  { %3451 = vmatprep.mubr.msk.bf16.mxu1 %vm3704_vm1, %v3703_v3  ;;  %3461 = vmatprep.subr.bf16.mxu1 %v3703_v3 }
 0xae7   :  { %v1774_v45 = vpop.f32.mrb[56].mxu1 }
 0xae8   :  { %v4213_v46 = vmul.f32 0.35355338, %v1774_v45  ;;  %v3405_v47 = vpop.f32.mrb[57].mxu1 }
 0xae9   :  { %v1777_v48 = vpop.f32.mrb[58].mxu1 }
 0xaea   :  { %v3406_v49 = vpop.f32.mrb[59].mxu1  ;;  %v2131_v53 = vsel %vm354_vm8, %v4213_v46, -inf }
 0xaeb   :  { %2132 = vmax.xlane.f32.xlu0 %v2131_v53  ;;  %v1823_v56 = vpop.f32.mrb[48].mxu0 }
 0xaec   :  { %v2124_v57 = vmul.f32 0.35355338, %v1823_v56  ;;  %v3411_v58 = vpop.f32.mrb[49].mxu0 }
 0xaed   :  { %v1826_v61 = vpop.f32.mrb[50].mxu0 }
 0xaee   :  { %v3412_v62 = vpop.f32.mrb[51].mxu0  ;;  %v2134_v59 = vsel %vm354_vm8, %v2124_v57, -inf }
 0xaef   :  { %2135 = vmax.xlane.f32.xlu1 %v2134_v59 }
 0xb5a   :  { %v1872_v50 = vpop.f32.mrb[60].mxu1  ;;  %v1921_v2 = vpop.f32.mrb[52].mxu0 }
 0xb5b   :  { %v2125_v4 = vmul.f32 0.35355338, %v1872_v50  ;;  %v3417_v5 = vpop.f32.mrb[61].mxu1  ;;  %v3423_v6 = vpop.f32.mrb[53].mxu0  ;;  %v2126_v40 = vmul.f32 0.35355338, %v1921_v2 }
 0xb5c   :  { %v1875_v7 = vpop.f32.mrb[62].mxu1  ;;  %v1924_v8 = vpop.f32.mrb[54].mxu0 }
 0xb5d   :  { %v3418_v10 = vpop.f32.mrb[63].mxu1  ;;  %v3424_v11 = vpop.f32.mrb[55].mxu0  ;;  %v2137_v13 = vsel %vm354_vm8, %v2125_v4, -inf  ;;  %v2140_v15 = vsel %vm354_vm8, %v2126_v40, -inf }
 0xb5e   :  { %2138 = vmax.xlane.f32.xlu0 %v2137_v13 }
 0xb62   :  { %v1970_v16 = vpop.f32.mrb[64].mxu1  ;;  %2141 = vmax.xlane.f32.xlu0 %v2140_v15  ;;  %v2019_v18 = vpop.f32.mrb[56].mxu0 }
 0xb63   :  { %v4220_v21 = vmul.f32 0.35355338, %v1970_v16  ;;  %v4222_v23 = vmul.f32 0.35355338, %v2019_v18  ;;  %v3429_v37 = vpop.f32.mrb[65].mxu1  ;;  %v3435_v25 = vpop.f32.mrb[57].mxu0 }
 0xb64   :  { %v1973_v26 = vpop.f32.mrb[66].mxu1  ;;  %v2022_v38 = vpop.f32.mrb[58].mxu0 }
 0xb65   :  { %v3430_v27 = vpop.f32.mrb[67].mxu1  ;;  %v3436_v30 = vpop.f32.mrb[59].mxu0  ;;  %v2143_v22 = vsel %vm354_vm8, %v4220_v21, -inf  ;;  %v2146_v28 = vsel %vm354_vm8, %v4222_v23, -inf }
 0xb66   :  { %2144 = vmax.xlane.f32.xlu1 %v2143_v22  ;;  %2147 = vmax.xlane.f32.xlu0 %v2146_v28 }
 0xb6a   :  { %v2068_v31 = vpop.f32.mrb[68].mxu1  ;;  %v2117_v32 = vpop.f32.mrb[60].mxu0 }
 0xb6b   :  { %v2129_v33 = vmul.f32 0.35355338, %v2068_v31  ;;  %v2130_v34 = vmul.f32 0.35355338, %v2117_v32  ;;  %v3441_v35 = vpop.f32.mrb[69].mxu1  ;;  %v3447_v60 = vpop.f32.mrb[61].mxu0 }
 0xb6c   :  { %v2071_v42 = vpop.f32.mrb[70].mxu1  ;;  %v2120_v36 = vpop.f32.mrb[62].mxu0 }
 0xb6d   :  { %v3442_v39 = vpop.f32.mrb[71].mxu1  ;;  %v3448_v43 = vpop.f32.mrb[63].mxu0  ;;  %v2149_v44 = vsel %vm354_vm8, %v2129_v33, -inf  ;;  %v2152_v45 = vsel %vm354_vm8, %v2130_v34, -inf }
 0xb6e   :  { %2150 = vmax.xlane.f32.xlu1 %v2149_v44  ;;  %2153 = vmax.xlane.f32.xlu0 %v2152_v45 }
 0xb78   :  { %v2133_v49 = vpop.xlane.xlu0 %2132 }
 0xb79   :  { %v2155_v53 = vsub.f32 %v4213_v46, %v2133_v49 }
 0xb7b   :  { %v2163_v58 = vmul.f32 1.442695, %v2155_v53 }
 0xb7c   :  { %v2136_v47 = vpop.xlane.xlu1 %2135 }
 0xb7d   :  { %v2156_v48 = vsub.f32 %v2124_v57, %v2136_v47 }
 0xb7f   :  { %2323 = vrot.lane.b32.xlu1 %v4141_v20, %s3710_s21  ;;  %v2165_v56 = vmul.f32 1.442695, %v2156_v48 }
 0xb81   :  { %3619 = vpow2.f32 %v2165_v56 }
 0xb82   :  { %3621 = vpow2.f32 %v2163_v58 }
 0xb83   :  { %2371 = vrot.lane.b32.xlu1 %v4139_v19, %s3710_s21 }
 0xb84   :  { %2275 = vrot.lane.b32.xlu0 %v4135_v9, %s3710_s21 }
 0xb8b   :  { %v3620_v61 = vpop.eup %3619 }
 0xb8c   :  { %v2182_v62 = vsel %vm354_vm8, %v3620_v61, 0.0  ;;  %v4238_v59 = vpop.eup %3621 }
 0xb8d   :  { %v2179_v19 = vsel %vm354_vm8, %v4238_v59, 0.0 }
 0xba3   :  { %2183 = vadd.xlane.f32.xlu0 %v2182_v62 }
 0xba7   :  { %2180 = vadd.xlane.f32.xlu1 %v2179_v19 }
 0xbeb   :  { %v2139_v9 = vpop.xlane.xlu0 %2138 }
 0xbec   :  { %v2157_v20 = vsub.f32 %v2125_v4, %v2139_v9 }
 0xbee   :  { %v2167_v57 = vmul.f32 1.442695, %v2157_v20 }
 0xbef   :  { %v2142_v50 = vpop.xlane.xlu0 %2141 }
 0xbf0   :  { %3623 = vpow2.f32 %v2167_v57  ;;  %v2158_v46 = vsub.f32 %v2126_v40, %v2142_v50 }
 0xbf2   :  { %v2169_v2 = vmul.f32 1.442695, %v2158_v46 }
 0xbf3   :  { %v2148_v5 = vpop.xlane.xlu0 %2147  ;;  %v2145_v40 = vpop.xlane.xlu1 %2144 }
 0xbf4   :  { %3625 = vpow2.f32 %v2169_v2  ;;  %v2159_v15 = vsub.f32 %v4220_v21, %v2145_v40  ;;  %v2160_v18 = vsub.f32 %v4222_v23, %v2148_v5 }
 0xbf6   :  { %v2171_v37 = vmul.f32 1.442695, %v2159_v15  ;;  %v2173_v26 = vmul.f32 1.442695, %v2160_v18 }
 0xbf8   :  { %3627 = vpow2.f32 %v2171_v37  ;;  %v3089_v37 = vld [vmem:[%s4459_s4 + $0x20] sm:$0xff] }
 0xbf9   :  { %3629 = vpow2.f32 %v2173_v26 }
 0xbfa   :  { %v4242_v6 = vpop.eup %3623 }
 0xbfb   :  { %v2154_v7 = vpop.xlane.xlu0 %2153  ;;  %v2185_v8 = vsel %vm354_vm8, %v4242_v6, 0.0  ;;  %v2151_v16 = vpop.xlane.xlu1 %2150 }
 0xbfc   :  { %2186 = vadd.xlane.f32.xlu1 %v2185_v8  ;;  %v2161_v25 = vsub.f32 %v2129_v33, %v2151_v16  ;;  %v2162_v27 = vsub.f32 %v2130_v34, %v2154_v7 }
 0xbfe   :  { %v4246_v10 = vpop.eup %3625  ;;  %v2175_v38 = vmul.f32 1.442695, %v2161_v25  ;;  %v2177_v30 = vmul.f32 1.442695, %v2162_v27  ;;  %v2612_v27 = vpack.c.bf16 %v3089_v37, %v3089_v37 }
 0xbff   :  { %v2276_v11 = vpop.permute.xlu0 %2275  ;;  %v2188_v4 = vsel %vm354_vm8, %v4246_v10, 0.0  ;;  %v2324_v22 = vpop.permute.xlu1 %2323 }
 0xc00   :  { %v2281_v13 = vsel %vm853_vm9, %v2276_v11, 0  ;;  %2189 = vadd.xlane.f32.xlu0 %v2188_v4  ;;  %3631 = vpow2.f32 %v2175_v38  ;;  %v2329_v48 = vsel %vm853_vm9, %v2324_v22, 0  ;;  %v2666_v22 = vsel %vm853_vm9, %v2612_v27, 0 }
 0xc01   :  { %3456 = vmatpush3.bf16.msra.mxu0 %v2281_v13  ;;  %3633 = vpow2.f32 %v2177_v30 }
 0xc02   :  { %3467 = vmatprep.subr.bf16.mxu0 %v3703_v3 }
 0xc03   :  { %v2372_v28 = vpop.permute.xlu1 %2371 }
 0xc04   :  { %v2377_v44 = vsel %vm853_vm9, %v2372_v28, 0 }
 0xc0d   :  { %2467 = vrot.lane.b32.xlu1 %v4148_v24, %s3710_s21  ;;  %v4258_v24 = vpop.eup %3627 }
 0xc0e   :  { %v2191_v23 = vsel %vm354_vm8, %v4258_v24, 0.0 }
 0xc16   :  { %2419 = vrot.lane.b32.xlu0 %v4150_v1, %s3710_s21  ;;  %v4260_v1 = vpop.eup %3629 }
 0xc17   :  { %v4264_v31 = vpop.eup %3631  ;;  %v2194_v34 = vsel %vm354_vm8, %v4260_v1, 0.0 }
 0xc18   :  { %v2197_v33 = vsel %vm354_vm8, %v4264_v31, 0.0  ;;  %v4270_v35 = vpop.eup %3633 }
 0xc19   :  { %v2200_v60 = vsel %vm354_vm8, %v4270_v35, 0.0 }
 0xc30   :  { %v2184_v21 = vpop.xlane.xlu0 %2183 }
 0xc31   :  { %3635 = vrcp.f32 %v2184_v21  ;;  %2192 = vadd.xlane.f32.xlu1 %v2191_v23 }
 0xc34   :  { %v2181_v32 = vpop.xlane.xlu1 %2180 }
 0xc35   :  { %3637 = vrcp.f32 %v2181_v32  ;;  %2198 = vadd.xlane.f32.xlu1 %v2197_v33  ;;  %2195 = vadd.xlane.f32.xlu0 %v2194_v34 }
 0xc39   :  { %2201 = vadd.xlane.f32.xlu0 %v2200_v60 }
 0xc3b   :  { %v3636_v42 = vpop.eup %3635 }
 0xc3c   :  { %v2212_v36 = vmul.f32 %v3636_v42, %v3620_v61 }
 0xc3e   :  { %v2220_v39 = vpack.c.bf16 %v2212_v36, %v2212_v36  ;;  %v3092_v36 = vld [vmem:[%s4459_s4 + $0x38] sm:$0xff] }
 0xc3f   :  { %v3638_v43 = vpop.eup %3637 }
 0xc40   :  { %v2211_v45 = vmul.f32 %v3638_v43, %v4238_v59  ;;  %3458 = vmatmul.mubr.msk.bf16.vlgmr.msra.gmra.mrb[64].mxu0 %vm354_vm8, %v2220_v39  ;;  %v2761_v39 = vpack.c.bf16 %v3092_v36, %v3092_v36 }
 0xc41   :  { %3468 = vmatpush3.bf16.msra.mxu0 %v2377_v44  ;;  %3469 = vmatprep.mubr.msk.bf16.mxu0 %vm3704_vm1, %v3703_v3  ;;  %v3091_v44 = vld [vmem:[%s4459_s4 + $0x30] sm:$0xff] }
 0xc42   :  { %v2219_v47 = vpack.c.bf16 %v2211_v45, %v2211_v45  ;;  %3479 = vmatprep.subr.bf16.mxu0 %v3703_v3  ;;  %v2766_v43 = vsel %vm853_vm9, %v2761_v39, 0 }
 0xc44   :  { %3452 = vmatmul.mubr.msk.bf16.vlgmr.msra.gmra.mrb[72].mxu1 %vm354_vm8, %v2219_v47 }
 0xc45   :  { %3462 = vmatpush3.bf16.msra.mxu1 %v2329_v48  ;;  %3463 = vmatprep.mubr.msk.bf16.mxu1 %vm3704_vm1, %v3703_v3  ;;  %v2710_v48 = vpack.c.bf16 %v3091_v44, %v3091_v44 }
 0xc46   :  { %2563 = vrot.lane.b32.xlu1 %v4161_v52, %s3710_s21  ;;  %3473 = vmatprep.subr.bf16.mxu1 %v3703_v3 }
 0xc4f   :  { %2515 = vrot.lane.b32.xlu0 %v4158_v51, %s3710_s21 }
 0xc89   :  { %v2187_v49 = vpop.xlane.xlu1 %2186 }
 0xc8a   :  { %3639 = vrcp.f32 %v2187_v49 }
 0xc8d   :  { %v2190_v53 = vpop.xlane.xlu0 %2189  ;;  %v2468_v52 = vpop.permute.xlu1 %2467 }
 0xc8e   :  { %3641 = vrcp.f32 %v2190_v53  ;;  %v2473_v20 = vsel %vm853_vm9, %v2468_v52, 0 }
 0xc91   :  { %v2420_v61 = vpop.permute.xlu0 %2419 }
 0xc92   :  { %v2425_v9 = vsel %vm853_vm9, %v2420_v61, 0 }
 0xc94   :  { %v3640_v56 = vpop.eup %3639 }
 0xc95   :  { %v2213_v58 = vmul.f32 %v3640_v56, %v4242_v6 }
 0xc97   :  { %v2221_v62 = vpack.c.bf16 %v2213_v58, %v2213_v58 }
 0xc98   :  { %v3642_v59 = vpop.eup %3641 }
 0xc99   :  { %v2214_v19 = vmul.f32 %v3642_v59, %v4246_v10  ;;  %3464 = vmatmul.mubr.msk.bf16.vlgmr.msra.gmra.mrb[76].mxu1 %vm354_vm8, %v2221_v62  ;;  %v2715_v62 = vsel %vm853_vm9, %v2710_v48, 0 }
 0xc9a   :  { %3474 = vmatpush3.bf16.msra.mxu1 %v2425_v9  ;;  %3475 = vmatprep.mubr.msk.bf16.mxu1 %vm3704_vm1, %v3703_v3 }
 0xc9b   :  { %v2222_v51 = vpack.c.bf16 %v2214_v19, %v2214_v19  ;;  %3485 = vmatprep.subr.bf16.mxu1 %v3703_v3 }
 0xc9d   :  { %3470 = vmatmul.mubr.msk.bf16.vlgmr.msra.gmra.mrb[68].mxu0 %vm354_vm8, %v2222_v51 }
 0xc9e   :  { %3480 = vmatpush3.bf16.msra.mxu0 %v2473_v20  ;;  %3481 = vmatprep.mubr.msk.bf16.mxu0 %vm3704_vm1, %v3703_v3 }
 0xc9f   :  { %3491 = vmatprep.subr.bf16.mxu0 %v3703_v3 }
 0xcbe   :  { %v2193_v57 = vpop.xlane.xlu1 %2192 }
 0xcbf   :  { %3643 = vrcp.f32 %v2193_v57 }
 0xcc2   :  { %v2199_v50 = vpop.xlane.xlu1 %2198  ;;  %v2196_v46 = vpop.xlane.xlu0 %2195 }
 0xcc3   :  { %3645 = vrcp.f32 %v2199_v50 }
 0xcc4   :  { %3647 = vrcp.f32 %v2196_v46 }
 0xcc6   :  { %v2202_v2 = vpop.xlane.xlu0 %2201  ;;  %v2564_v15 = vpop.permute.xlu1 %2563 }
 0xcc7   :  { %3649 = vrcp.f32 %v2202_v2  ;;  %v2569_v25 = vsel %vm853_vm9, %v2564_v15, 0 }
 0xcc9   :  { %v3644_v5 = vpop.eup %3643 }
 0xcca   :  { %v2215_v6 = vmul.f32 %v3644_v5, %v4258_v24  ;;  %v2516_v7 = vpop.permute.xlu0 %2515  ;;  %v3090_v24 = vld [vmem:[%s4459_s4 + $0x28] sm:$0xff] }
 0xccb   :  { %v2521_v4 = vsel %vm853_vm9, %v2516_v7, 0 }
 0xccc   :  { %v2223_v8 = vpack.c.bf16 %v2215_v6, %v2215_v6 }
 0xccd   :  { %v3646_v10 = vpop.eup %3645 }
 0xcce   :  { %v3648_v11 = vpop.eup %3647  ;;  %3476 = vmatmul.mubr.msk.bf16.vlgmr.msra.gmra.mrb[80].mxu1 %vm354_vm8, %v2223_v8  ;;  %v2217_v40 = vmul.f32 %v3646_v10, %v4264_v31 }
 0xccf   :  { %v2216_v13 = vmul.f32 %v3648_v11, %v4260_v1  ;;  %3486 = vmatpush3.bf16.msra.mxu1 %v2521_v4  ;;  %3487 = vmatprep.mubr.msk.bf16.mxu1 %vm3704_vm1, %v3703_v3  ;;  %v2614_v1 = vpack.c.bf16 %v3090_v24, %v3090_v24 }
 0xcd0   :  { %3497 = vmatprep.subr.bf16.mxu1 %v3703_v3  ;;  %v2225_v26 = vpack.c.bf16 %v2217_v40, %v2217_v40 }
 0xcd1   :  { %v2224_v16 = vpack.c.bf16 %v2216_v13, %v2216_v13  ;;  %v3650_v18 = vpop.eup %3649  ;;  %v2619_v28 = vsel %vm853_vm9, %v2614_v1, 0  ;;  %v3097_v1 = vld [vmem:[%s4461_s6 + $0x40] sm:$0xff] }
 0xcd2   :  { %v2218_v38 = vmul.f32 %v3650_v18, %v4270_v35 }
 0xcd3   :  { %3482 = vmatmul.mubr.msk.bf16.vlgmr.msra.gmra.mrb[72].mxu0 %vm354_vm8, %v2224_v16 }
 0xcd4   :  { %3492 = vmatpush3.bf16.msra.mxu0 %v2569_v25  ;;  %3493 = vmatprep.mubr.msk.bf16.mxu0 %vm3704_vm1, %v3703_v3  ;;  %v2226_v30 = vpack.c.bf16 %v2218_v38, %v2218_v38  ;;  %v3094_v38 = vld [vmem:[%s4460_s5 + $0x28] sm:$0xff] }
 0xcd5   :  { %3503 = vmatprep.subr.bf16.mxu0 %v3703_v3 }
 0xcd6   :  { %3488 = vmatmul.mubr.msk.bf16.vlgmr.msra.gmra.mrb[84].mxu1 %vm354_vm8, %v2225_v26  ;;  %v3093_v26 = vld [vmem:[%s4460_s5 + $0x20] sm:$0xff] }
 0xcd7   :  { %3499 = vmatprep.mubr.msk.bf16.mxu1 %vm3704_vm1, %v3703_v3  ;;  %3498 = vmatpush3.bf16.msra.mxu1 %v2619_v28  ;;  %v1643_v27 = vpack.c.bf16 %v3094_v38, %v3093_v26  ;;  %v3098_v28 = vld [vmem:[%s4461_s6 + $0x48] sm:$0xff] }
 0xcd8   :  { %3509 = vmatprep.subr.bf16.mxu1 %v3703_v3 }
 0xcdb   :  { %3494 = vmatmul.mubr.msk.bf16.vlgmr.msra.gmra.mrb[76].mxu0 %vm354_vm8, %v2226_v30  ;;  %v3095_v30 = vld [vmem:[%s4460_s5 + $0x30] sm:$0xff] }
 0xcdc   :  { %3504 = vmatpush3.bf16.msra.mxu0 %v2666_v22  ;;  %3505 = vmatprep.mubr.msk.bf16.mxu0 %vm3704_vm1, %v3703_v3  ;;  %v3096_v22 = vld [vmem:[%s4460_s5 + $0x38] sm:$0xff] }
 0xcdd   :  { %3515 = vmatprep.subr.bf16.mxu0 %v3703_v3  ;;  %v1644_v24 = vpack.c.bf16 %v3096_v22, %v3095_v30  ;;  %v4389_v22 = vld [vmem:[%s4457_s2 + $0x8] sm:$0x3f] }
 0xd13   :  { %v2317_v21 = vpop.f32.mrb[64].mxu0 }
 0xd14   :  { %v3459_v23 = vpop.f32.mrb[65].mxu0 }
 0xd15   :  { %v2320_v31 = vpop.f32.mrb[66].mxu0  ;;  %v1654_v23 = vpack.c.bf16 %v3098_v28, %v3097_v1 }
 0xd16   :  { %v3460_v32 = vpop.f32.mrb[67].mxu0  ;;  %v3100_v31 = vld [vmem:[%s4461_s6 + $0x58] sm:$0xff] }
 0xd17   :  { %v2269_v33 = vpop.f32.mrb[72].mxu1 }
 0xd18   :  { %v2611_v34 = vpack.c.bf16 %v2317_v21, %v2269_v33  ;;  %v3453_v35 = vpop.f32.mrb[73].mxu1  ;;  %v3099_v21 = vld [vmem:[%s4461_s6 + $0x50] sm:$0xff] }
 0xd19   :  { %v2272_v60 = vpop.f32.mrb[74].mxu1  ;;  %v1655_v32 = vpack.c.bf16 %v3100_v31, %v3099_v21 }
 0xd1a   :  { %v3454_v42 = vpop.f32.mrb[75].mxu1  ;;  %3506 = vmatmul.mubr.msk.bf16.vlgmr.msra.gmra.mrb[80].mxu0 %vm354_vm8, %v2611_v34 }
 0xd1b   :  { %3517 = vmatprep.mubr.msk.bf16.mxu0 %vm3704_vm1, %v3703_v3  ;;  %3516 = vmatpush3.bf16.msra.mxu0 %v2766_v43 }
 0xd1c   :  { %3529 = vmatprep.subr.bf16.mxu0 %v3703_v3 }
 0xd6c   :  { %v2365_v45 = vpop.f32.mrb[76].mxu1 }
 0xd6d   :  { %v3465_v47 = vpop.f32.mrb[77].mxu1 }
 0xd6e   :  { %v2368_v49 = vpop.f32.mrb[78].mxu1 }
 0xd6f   :  { %v3466_v53 = vpop.f32.mrb[79].mxu1 }
 0xd70   :  { %v2413_v56 = vpop.f32.mrb[68].mxu0 }
 0xd71   :  { %v2613_v58 = vpack.c.bf16 %v2413_v56, %v2365_v45  ;;  %v3471_v61 = vpop.f32.mrb[69].mxu0 }
 0xd72   :  { %v2416_v59 = vpop.f32.mrb[70].mxu0 }
 0xd73   :  { %v3472_v19 = vpop.f32.mrb[71].mxu0  ;;  %3500 = vmatmul.mubr.msk.bf16.vlgmr.msra.gmra.mrb[88].mxu1 %vm354_vm8, %v2613_v58 }
 0xd74   :  { %3510 = vmatpush3.bf16.msra.mxu1 %v2715_v62  ;;  %3511 = vmatprep.mubr.msk.bf16.mxu1 %vm3704_vm1, %v3703_v3 }
 0xd75   :  { %3521 = vmatprep.subr.bf16.mxu1 %v3703_v3 }
 0xda1   :  { %v2461_v9 = vpop.f32.mrb[80].mxu1 }
 0xda2   :  { %v3477_v52 = vpop.f32.mrb[81].mxu1 }
 0xda3   :  { %v2464_v51 = vpop.f32.mrb[82].mxu1 }
 0xda4   :  { %v3478_v20 = vpop.f32.mrb[83].mxu1 }
 0xda6   :  { %v2509_v57 = vpop.f32.mrb[72].mxu0 }
 0xda7   :  { %v2709_v50 = vpack.c.bf16 %v2509_v57, %v2461_v9  ;;  %v3483_v46 = vpop.f32.mrb[73].mxu0 }
 0xda8   :  { %v2512_v2 = vpop.f32.mrb[74].mxu0 }
 0xda9   :  { %v3484_v5 = vpop.f32.mrb[75].mxu0  ;;  %3512 = vmatmul.mubr.msk.bf16.vlgmr.msra.gmra.mrb[92].mxu1 %vm354_vm8, %v2709_v50  ;;  %v2557_v6 = vpop.f32.mrb[84].mxu1 }
 0xdaa   :  { %v3489_v7 = vpop.f32.mrb[85].mxu1  ;;  %3525 = vmatprep.mubr.msk.bf16.mxu1 %vm3704_vm1, %v3703_v3  ;;  %3522 = vmatpush3.bf16.msra.mxu1 %v1643_v27 }
 0xdab   :  { %v2560_v8 = vpop.f32.mrb[86].mxu1  ;;  %3523 = vmatprep.subr.bf16.mxu1 %v3703_v3 }
 0xdac   :  { %v3490_v10 = vpop.f32.mrb[87].mxu1 }
 0xdae   :  { %v2605_v11 = vpop.f32.mrb[76].mxu0  ;;  %3524 = vmatpush3.bf16.msra.mxu1 %v1644_v24  ;;  %v2847_v24 = vrot.slane %v4389_v22, %v3802_v29  ;;  %v3102_v29 = vld [vmem:[%s4461_s6 + $0x68] sm:$0xff] }
 0xdaf   :  { %v2760_v4 = vpack.c.bf16 %v2605_v11, %v2557_v6  ;;  %v3495_v13 = vpop.f32.mrb[77].mxu0 }
 0xdb0   :  { %v2608_v40 = vpop.f32.mrb[78].mxu0 }
 0xdb1   :  { %v3496_v15 = vpop.f32.mrb[79].mxu0  ;;  %3518 = vmatmul.mubr.msk.bf16.vlgmr.msra.gmra.mrb[84].mxu0 %vm354_vm8, %v2760_v4 }
 0xdb2   :  { %3537 = vmatprep.mubr.msk.bf16.mxu0 %vm3704_vm1, %v3703_v3  ;;  %3530 = vmatpush3.bf16.msra.mxu0 %v1654_v23  ;;  %v2853_v23 = vrot.slane %v4389_v22, %v1474_v41  ;;  %v3103_v41 = vld [vmem:[%s4461_s6 + $0x70] sm:$0xff] }
 0xdb3   :  { %3531 = vmatprep.subr.bf16.mxu0 %v3703_v3 }
 0xdb6   :  { %3532 = vmatpush3.bf16.msra.mxu0 %v1655_v32 }
 0xdb7   :  { %3533 = vmatprep.subr.bf16.mxu0 %v3703_v3 }
 0xded   :  { %v2702_v16 = vpop.f32.mrb[80].mxu0 }
 0xdee   :  { %v3507_v18 = vpop.f32.mrb[81].mxu0 }
 0xdef   :  { %v2705_v37 = vpop.f32.mrb[82].mxu0 }
 0xdf0   :  { %v3508_v25 = vpop.f32.mrb[83].mxu0 }
 0xe46   :  { %v2655_v33 = vpop.f32.mrb[88].mxu1 }
 0xe47   :  { %v2703_v34 = vadd.f32 %v2702_v16, %v2655_v33  ;;  %v3501_v35 = vpop.f32.mrb[89].mxu1 }
 0xe48   :  { %v2658_v60 = vpop.f32.mrb[90].mxu1 }
 0xe49   :  { %v2706_v42 = vadd.f32 %v2705_v37, %v2658_v60  ;;  %v3502_v36 = vpop.f32.mrb[91].mxu1  ;;  %v3101_v60 = vld [vmem:[%s4461_s6 + $0x60] sm:$0xff] }
 0xe4a   :  { %v3104_v36 = vld [vmem:[%s4461_s6 + $0x78] sm:$0xff]  ;;  %s3711_s6 = smov [#allocation2]  }
 0xe4b   :  { %s3031_s26 = sshll.u32 %s3711_s6, 4  ;;  %s3032_s26 = int_to_ptr.vmem [resolvable:$true] %s3031_s26 }
 0xe4c   :  { %s3655_s27 = scalar_lea.vmem %s3032_s26, 256  ;;  %p3660_p1 = scmp.lt.s32.totalorder %s3032_s26, %s3032_s26 }
 0xe4d   :  { %p3656_p0 = scmp.ne.s32.totalorder %s3032_s26, %s3655_s27  ;;  %p3661_p2 = scmp.lt.s32.totalorder %s3655_s27, %s3655_s27 }
 0xe4f   :  { %p3662_p3 = por %p3661_p2, %p3660_p1 }
 0xe51   :  { %p3663_p4 = pnand %p3662_p3, %p3656_p0 }
 0xe7c   :  { %v2751_v39 = vpop.f32.mrb[92].mxu1 }
 0xe7d   :  { %v2758_v43 = vadd.f32 %v2751_v39, %v2703_v34  ;;  %v3513_v44 = vpop.f32.mrb[93].mxu1  ;;  %v1657_v39 = vpack.c.bf16 %v3104_v36, %v3103_v41 }
 0xe7e   :  { %v2754_v45 = vpop.f32.mrb[94].mxu1 }
 0xe7f   :  { %v2759_v47 = vadd.f32 %v2754_v45, %v2706_v42  ;;  %v3514_v48 = vpop.f32.mrb[95].mxu1  ;;  %v1656_v42 = vpack.c.bf16 %v3102_v29, %v3101_v60 }
 0xe81   :  { %3534 = vmatpush3.bf16.msra.mxu0 %v1656_v42 }
 0xe82   :  { %3535 = vmatprep.subr.bf16.mxu0 %v3703_v3 }
 0xe84   :  { %v2802_v49 = vpop.f32.mrb[84].mxu0 }
 0xe85   :  { %v2809_v53 = vadd.f32 %v2802_v49, %v2758_v43  ;;  %v3519_v56 = vpop.f32.mrb[85].mxu0  ;;  %3536 = vmatpush3.bf16.msra.mxu0 %v1657_v39  ;;  %v2860_v43 = vrot.slane %v4389_v22, %v3796_v17 }
 0xe86   :  { %v2805_v58 = vpop.f32.mrb[86].mxu0 }
 0xe87   :  { %v2811_v61 = vadd.f32 %v2809_v53, %v4124_v63  ;;  %v2810_v62 = vadd.f32 %v2805_v58, %v2759_v47  ;;  %v3520_v59 = vpop.f32.mrb[87].mxu0 }
 0xe89   :  { %v2822_v19 = vmul.f32 %v2811_v61, %v2811_v61  ;;  %v2812_v9 = vadd.f32 %v2810_v62, %v4122_v0  ;;  %v2813_v52 = vsel %vm278_vm7, %v2811_v61, 0.0 }
 0xe8b   :  { %v2814_v51 = vsel %vm278_vm7, %v2812_v9, 0.0  ;;  %v2823_v20 = vmul.f32 %v2812_v9, %v2812_v9  ;;  %v2824_v50 = vsel %vm278_vm7, %v2822_v19, 0.0 }
 0xe8c   :  { %v2815_v57 = vadd.f32 %v2814_v51, %v2813_v52 }
 0xe8d   :  { %v2825_v46 = vsel %vm278_vm7, %v2823_v20, 0.0 }
 0xe8e   :  { %v2816_v2 = vrot.slane %v2815_v57, 4  ;;  %v2826_v5 = vadd.f32 %v2825_v46, %v2824_v50 }
 0xe90   :  { %v2817_v6 = vadd.f32 %v2816_v2, %v2815_v57  ;;  %v2827_v7 = vrot.slane %v2826_v5, 4 }
 0xe92   :  { %v2818_v63 = vrot.slane %v2817_v6, 2  ;;  %v2828_v8 = vadd.f32 %v2827_v7, %v2826_v5 }
 0xe94   :  { %v2819_v10 = vadd.f32 %v2818_v63, %v2817_v6  ;;  %v2829_v11 = vrot.slane %v2828_v8, 2 }
 0xe96   :  { %v2820_v4 = vrot.slane %v2819_v10, 1  ;;  %v2830_v0 = vadd.f32 %v2829_v11, %v2828_v8 }
 0xe98   :  { %v2821_v13 = vadd.f32 %v2820_v4, %v2819_v10  ;;  %v2831_v40 = vrot.slane %v2830_v0, 1 }
 0xe9a   :  { %v2832_v15 = vadd.f32 %v2831_v40, %v2830_v0  ;;  %v2833_v16 = vmul.f32 0.0625, %v2821_v13 }
 0xe9c   :  { %v2834_v18 = vmul.f32 0.0625, %v2832_v15  ;;  %v2835_v37 = vmul.f32 %v2833_v16, %v2833_v16  ;;  %v2840_v25 = vsub.f32 %v2811_v61, %v2833_v16  ;;  %v2841_v26 = vsub.f32 %v2812_v9, %v2833_v16 }
 0xe9d   :  { %v2911_v61 = vrot.slane %v4389_v22, %v1532_v12 }
 0xe9e   :  { %v2836_v38 = vsub.f32 %v2834_v18, %v2835_v37 }
 0xea0   :  { %v2837_v27 = vmax.f32 %v2836_v38, 0.0 }
 0xea2   :  { %v2838_v30 = vadd.f32 1e-05, %v2837_v27 }
 0xea4   :  { %3651 = vrsqrt.f32 %v2838_v30 }
 0xeae   :  { %v3652_v1 = vpop.eup %3651 }
 0xeaf   :  { %v2842_v28 = vmul.f32 %v3652_v1, %v2840_v25  ;;  %v2843_v21 = vmul.f32 %v3652_v1, %v2841_v26 }
 0xeb1   :  { %v2848_v31 = vmul.f32 %v2847_v24, %v2842_v28  ;;  %v2849_v32 = vmul.f32 %v2847_v24, %v2843_v21  ;;  %v2992_v21 = vrot.slane %v4389_v22, %v1614_v54 }
 0xeb3   :  { %v2855_v33 = vadd.f32 %v2853_v23, %v2849_v32  ;;  %v2854_v34 = vadd.f32 %v2853_v23, %v2848_v31 }
 0xeb5   :  { %v2856_v35 = vpack.c.bf16 %v2855_v33, %v2854_v34 }
 0xeb7   :  { %3526 = vmatmul.mubr.msk.bf16.vlgmr.msra.gmra.mrb[96].mxu1 %vm278_vm7, %v2856_v35 }
 0xf8a   :  { %v2898_v44 = vpop.f32.mrb[96].mxu1 }
 0xf8b   :  { %v2899_v45 = vadd.f32 %v2898_v44, %v2860_v43  ;;  %v3527_v47 = vpop.f32.mrb[97].mxu1 }
 0xf8c   :  { %v2901_v48 = vpop.f32.mrb[98].mxu1 }
 0xf8d   :  { %v2902_v49 = vadd.f32 %v2901_v48, %v2860_v43  ;;  %v3528_v53 = vpop.f32.mrb[99].mxu1  ;;  %v2905_v3 = vmax.f32 %v2899_v45, 0.0 }
 0xf8f   :  { %v2906_v56 = vmax.f32 %v2902_v49, 0.0 }
 0xf91   :  { %v2907_v58 = vpack.c.bf16 %v2906_v56, %v2905_v3 }
 0xf93   :  { %3538 = vmatmul.mubr.msk.bf16.vlgmr.msra.gmra.mrb[88].mxu0 %vm1534_vm10, %v2907_v58 }
0x1066   :  { %v2949_v62 = vpop.f32.mrb[88].mxu0 }
0x1067   :  { %v2950_v59 = vadd.f32 %v2949_v62, %v2911_v61  ;;  %v3539_v19 = vpop.f32.mrb[89].mxu0 }
0x1068   :  { %v2952_v9 = vpop.f32.mrb[90].mxu0 }
0x1069   :  { %v2956_v17 = vadd.f32 %v2950_v59, %v2854_v34  ;;  %v2953_v52 = vadd.f32 %v2952_v9, %v2911_v61  ;;  %v3540_v51 = vpop.f32.mrb[91].mxu0 }
0x106b   :  { %v2967_v20 = vmul.f32 %v2956_v17, %v2956_v17  ;;  %v2957_v57 = vadd.f32 %v2953_v52, %v2855_v33  ;;  %v2958_v50 = vsel %vm278_vm7, %v2956_v17, 0.0  ;;  %v2998_v33 = vrot.slane %v4389_v22, %v1620_v55 }
0x106d   :  { %v2959_v46 = vsel %vm278_vm7, %v2957_v57, 0.0  ;;  %v2968_v2 = vmul.f32 %v2957_v57, %v2957_v57  ;;  %v2969_v6 = vsel %vm278_vm7, %v2967_v20, 0.0 }
0x106e   :  { %v2960_v5 = vadd.f32 %v2959_v46, %v2958_v50 }
0x106f   :  { %v2970_v7 = vsel %vm278_vm7, %v2968_v2, 0.0 }
0x1070   :  { %v2961_v12 = vrot.slane %v2960_v5, 4  ;;  %v2971_v63 = vadd.f32 %v2970_v7, %v2969_v6 }
0x1072   :  { %v2962_v8 = vadd.f32 %v2961_v12, %v2960_v5  ;;  %v2972_v10 = vrot.slane %v2971_v63, 4 }
0x1074   :  { %v2963_v11 = vrot.slane %v2962_v8, 2  ;;  %v2973_v4 = vadd.f32 %v2972_v10, %v2971_v63 }
0x1076   :  { %v2964_v0 = vadd.f32 %v2963_v11, %v2962_v8  ;;  %v2974_v13 = vrot.slane %v2973_v4, 2 }
0x1078   :  { %v2965_v40 = vrot.slane %v2964_v0, 1  ;;  %v2975_v15 = vadd.f32 %v2974_v13, %v2973_v4 }
0x107a   :  { %v2966_v16 = vadd.f32 %v2965_v40, %v2964_v0  ;;  %v2976_v18 = vrot.slane %v2975_v15, 1 }
0x107c   :  { %v2977_v37 = vadd.f32 %v2976_v18, %v2975_v15  ;;  %v2978_v25 = vmul.f32 0.0625, %v2966_v16 }
0x107e   :  { %v2979_v26 = vmul.f32 0.0625, %v2977_v37  ;;  %v2980_v38 = vmul.f32 %v2978_v25, %v2978_v25  ;;  %v2986_v27 = vsub.f32 %v2957_v57, %v2978_v25  ;;  %v2985_v30 = vsub.f32 %v2956_v17, %v2978_v25 }
0x1080   :  { %v2981_v24 = vsub.f32 %v2979_v26, %v2980_v38 }
0x1082   :  { %v2982_v1 = vmax.f32 %v2981_v24, 0.0 }
0x1084   :  { %v2983_v28 = vadd.f32 1e-05, %v2982_v1 }
0x1086   :  { %3653 = vrsqrt.f32 %v2983_v28 }
0x1090   :  { %v3654_v23 = vpop.eup %3653 }
0x1091   :  { %v2988_v31 = vmul.f32 %v3654_v23, %v2986_v27  ;;  %v2987_v32 = vmul.f32 %v3654_v23, %v2985_v30 }
0x1093   :  { %v2993_v34 = vmul.f32 %v2992_v21, %v2987_v32  ;;  %v2994_v35 = vmul.f32 %v2992_v21, %v2988_v31 }
0x1095   :  { %v2999_v60 = vadd.f32 %v2998_v33, %v2993_v34  ;;  %v3000_v29 = vadd.f32 %v2998_v33, %v2994_v35 }
0x1097   :  { %3001 = vst.msk [vmem:[#allocation2] sm:$0xff] %vm278_vm7, %v2999_v60  ;;  %3002 = vst.msk [vmem:[#allocation2 + $0x8] sm:$0xff] %vm278_vm7, %v3000_v29  ;;  %v3003_v54 = vsel %vm278_vm7, %v2999_v60, 0.0  ;;  %v3010_v42 = vsel %vm278_vm7, %v3000_v29, 0.0 }
0x1098   :  { %v3004_v41 = vrot.slane %v3003_v54, 4  ;;  %v3011_v36 = vrot.slane %v3010_v42, 4 }
0x1099   :  { %3666 = shalt.err (!%p3663_p4)
}
0x109a   :  { %s3667_s29 = scalar_lea.hbm %s4462_s7, 256 }
0x109b   :  { %p3668_p5 = scmp.ne.s32.totalorder %s4462_s7, %s3667_s29  ;;  %p3671_p6 = scmp.lt.u32.totalorder %s3667_s29, %s4462_s7 }
0x109d   :  { %p3673_p7 = pnand %p3671_p6, %p3668_p5 }
0x109f   :  { %3676 = shalt.err (!%p3673_p7)
}
0x10a0   :  { %s3712_s1 = smov 128   ;;  %s3713_s11 = smov 8   ;;  %v3005_v14 = vadd.f32 %v3004_v41, %v3003_v54  ;;  %v3012_v55 = vadd.f32 %v3011_v36, %v3010_v42  ;;  %vm3024_vm11 = vcmask 254976  }
0x10a1   :  { %3037 = dma.vmem_to_hbm [thread:$0]  %s3032_s26, 256, %s4462_s7, [#allocation3], %s3712_s1, %s3712_s1, %s3713_s11  }
0x10a2   :  { %v3006_v22 = vrot.slane %v3005_v14, 2  ;;  %v3013_v39 = vrot.slane %v3012_v55, 2  ;;  %s3714_s14 = smov [#allocation4]  }
0x10a3   :  { %s3044_s15 = sshll.u32 %s3714_s14, 4  ;;  %s3045_s15 = int_to_ptr.vmem [resolvable:$true] %s3044_s15 }
0x10a4   :  { %v3007_v43 = vadd.f32 %v3006_v22, %v3005_v14  ;;  %v3014_v44 = vadd.f32 %v3013_v39, %v3012_v55  ;;  %s3677_s7 = scalar_lea.vmem %s3045_s15, 32  ;;  %p3682_p9 = scmp.lt.s32.totalorder %s3045_s15, %s3045_s15 }
0x10a5   :  { %p3678_p8 = scmp.ne.s32.totalorder %s3045_s15, %s3677_s7  ;;  %p3683_p10 = scmp.lt.s32.totalorder %s3677_s7, %s3677_s7 }
0x10a6   :  { %v3008_v45 = vrot.slane %v3007_v43, 1  ;;  %v3015_v47 = vrot.slane %v3014_v44, 1 }
0x10a7   :  { %p3684_p11 = por %p3683_p10, %p3682_p9 }
0x10a8   :  { %v3009_v48 = vadd.f32 %v3008_v45, %v3007_v43  ;;  %v3016_v49 = vadd.f32 %v3015_v47, %v3014_v44 }
0x10a9   :  { %p3685_p12 = pnand %p3684_p11, %p3678_p8 }
0x10aa   :  { %v3018_v53 = vmul.f32 0.125, %v3009_v48  ;;  %v3019_v3 = vmul.f32 0.125, %v3016_v49 }
0x10ac   :  { %v3022_v56 = vsel %vm41_vm2, %v3019_v3, %v3018_v53 }
0x10ad   :  { %3025 = vst.msk [vmem:[#allocation4] sm:$0x3] %vm3024_vm11, %v3022_v56 }
0x10ae   :  { %3688 = shalt.err (!%p3685_p12)
}
0x10af   :  { %s3689_s23 = scalar_lea.hbm %s4463_s8, 32 }
0x10b0   :  { %p3690_p13 = scmp.ne.s32.totalorder %s4463_s8, %s3689_s23  ;;  %p3693_p0 = scmp.lt.u32.totalorder %s3689_s23, %s4463_s8 }
0x10b2   :  { %p3695_p1 = pnand %p3693_p0, %p3690_p13 }
0x10b4   :  { %3698 = shalt.err (!%p3695_p1)
}
0x10b5   :  { %3047 = dma.vmem_to_hbm [thread:$0]  %s3045_s15, 32, %s4463_s8, [#allocation5]  }
0x10b6   :  { %3699 = dma.done.wait [#allocation3], 256  }
0x10b7   :  { %3700 = vsyncadd [#allocation3], 4294967040 }
0x10b8   :  { %3701 = dma.done.wait [#allocation5], 32  }
0x10b9   :  { %3702 = vsyncadd [#allocation5], 4294967264 }
0x10ba   :  { %3054 = vsyncpa [#allocation3], 1 }
0x10bb   :  { %3055 = vsyncpa [#allocation5], 1 }

</bundles_post_ra>
